<compile_context>
chip_gen: v5e
topology: v5e:2x2
jax: 0.10.0
libtpu: 0.0.40
codegen_flags: <defaults>
</compile_context>

<pallas_src>
import jax
import jax.numpy as jnp
from jax.experimental import pallas as pl
from jax.experimental.pallas import tpu as pltpu


# ----------------------------------------------------------------------------
# Kernel
# ----------------------------------------------------------------------------
def _ffa_kernel(x_ref, wt_ref, b_ref, v_ref, o_ref):
    # x_ref : (Bt, C, T)  native NCT block (no HBM-side transpose)
    # wt_ref: (H, C)      b_ref: (H, 1)    v_ref: (H, 1)
    # o_ref : (Bt, C)
    x = x_ref[...]                                             # (Bt, C, T), in dtype
    bt = x.shape[0]
    h_dim, c_dim = wt_ref.shape

    # Hidden projection on the MXU, batched over the fused batch block:
    #   h[b, i, t] = tanh( sum_c Wt[i, c] * x[b, c, t] + bias[i] )
    # (Batched 3-D dot: proven Mosaic lowering; the (Bt,H,C) weight broadcast
    #  is small and counted in the VMEM estimate.)
    wt_b = jnp.broadcast_to(wt_ref[...].astype(x.dtype)[None],
                            (bt, h_dim, c_dim))                # (Bt, H, C)
    h = jnp.tanh(
        jnp.einsum("bhc,bct->bht", wt_b, x,
                   preferred_element_type=jnp.float32)
        + b_ref[...][None]                                     # (1, H, 1)
    )                                                          # (Bt, H, T) f32

    # Attention logits over time: VPU multiply + cross-sublane reduce over H
    # (avoids an N=1 MXU matmul for trivial work).
    e = jnp.sum(h * v_ref[...][None], axis=1, keepdims=True)   # (Bt, 1, T)

    # Numerically-stable softmax over T (the lane dim); keep p un-normalized.
    e = e - jnp.max(e, axis=2, keepdims=True)
    p = jnp.exp(e)                                             # (Bt, 1, T) f32
    denom = jnp.sum(p, axis=2, keepdims=True)                  # (Bt, 1, 1)

    # Weighted pooling over time: accumulate in f32 regardless of input dtype
    # (x * p broadcast over C, lane reduce over T on the XLU slot).
    xf = x.astype(jnp.float32)
    acc = jnp.sum(xf * p, axis=2)                              # (Bt, C) f32

    # Normalize once at the end; the divide goes to the EUP slot (approx vrcp)
    # which is free relative to the VPU/XLU work above.
    inv = pl.reciprocal(denom, approx=True)[:, :, 0]           # (Bt, 1)
    o_ref[...] = (acc * inv).astype(o_ref.dtype)


# ----------------------------------------------------------------------------
# Host-side sizing helpers
# ----------------------------------------------------------------------------
def _rup(x, m):
    return ((x + m - 1) // m) * m


def _block_vmem_bytes(bb, C, T, H, in_itemsize):
    """Conservative per-step VMEM footprint: double-buffered I/O blocks plus
    all in-kernel intermediates, with (8, 128) sublane/lane padding."""
    f32 = 4
    t_pad = _rup(T, 128)          # T lives on lanes
    c_lane = _rup(C, 128)         # C on lanes for the output block
    c_sub = _rup(C, 8)            # C on sublanes for the input block
    h_sub = _rup(H, 8)
    bb_sub = _rup(bb, 8)

    x_db = 2 * bb * c_sub * t_pad * in_itemsize      # input block, double-buffered
    out_db = 2 * bb_sub * c_lane * f32               # output block, double-buffered
    w_db = 2 * (h_sub * c_lane + 2 * h_sub * 128) * f32   # weights / bias / v
    w_bcast = bb * h_sub * c_lane * f32              # broadcast weights in kernel
    h_proj = bb * h_sub * t_pad * f32                # tanh projection
    # f32 copy of x (bf16 inputs), x*p product, exp/softmax temporaries.
    ew_temps = 2 * bb * c_sub * t_pad * f32 + 4 * bb_sub * t_pad * f32
    return x_db + out_db + w_db + w_bcast + h_proj + ew_temps


def _tpu_generation_info():
    """Returns (block_budget_bytes, vmem_limit_cap_bytes, min_grid_steps)."""
    kind = ""
    try:
        kind = jax.devices()[0].device_kind.lower()
    except Exception:  # pragma: no cover - sizing heuristics only
        pass
    if "v7" in kind:
        # 64 MiB physical VMEM, 2 TensorCores/chip: tight budget, leave
        # compiler headroom, and demand >= 2 pipelined steps per core.
        return 40 << 20, 48 << 20, 4
    if "v6" in kind or "v5 lite" in kind or "v5e" in kind or "lite" in kind:
        # 128 MiB VMEM, 1 TensorCore: tiny slabs are grid-overhead-bound, so
        # allow big blocks and a high vmem_limit.
        return 88 << 20, 100 << 20, 2
    if "v5" in kind:
        # v5p: 128 MiB VMEM, megacore (2 TCs) -> 2 steps per core.
        return 88 << 20, 100 << 20, 4
    # Unknown generation: conservative on VMEM, generous on step count.
    return 40 << 20, 48 << 20, 4


def _pick_block_b(B, C, T, H, in_itemsize, *, budget, min_steps):
    """Largest layout-legal batch block that fits the VMEM budget while
    leaving >= min_steps grid steps for pipelining."""
    # Layout rule for the (block_b, C) output block: block_b % 8 == 0, or
    # block_b == B (full extent).
    cands = sorted({bb for bb in (256, 128, 64, 32, 16, 8) if B % bb == 0} | {B},
                   reverse=True)
    fitting = [bb for bb in cands
               if _block_vmem_bytes(bb, C, T, H, in_itemsize) <= budget]
    if not fitting:
        min_bb = min(cands)
        need = _block_vmem_bytes(min_bb, C, T, H, in_itemsize)
        raise ValueError(
            "multi_head_ffa: smallest layout-legal batch block "
            f"({min_bb} rows, ~{need >> 20} MiB incl. intermediates) exceeds "
            f"the per-step VMEM budget ({budget >> 20} MiB). "
            "TODO(synk): add a T-tiled online-softmax variant for large C*T.")
    # Largest block that still leaves >= min_steps grid steps so BlockSpec
    # double-buffering can hide the (Bt, C, T) HBM read behind compute.
    for bb in fitting:
        if B // bb >= min_steps:
            return bb
    # Not enough batch to pipeline at any legal block size: take the smallest
    # fitting block to maximize the step count.
    return fitting[-1]


# ----------------------------------------------------------------------------
# Public wrapper
# ----------------------------------------------------------------------------
def multi_head_ffa(feature_map, W, b, v, *, block_b=None):
    """
    feature_map: (B, C, T), f32 or bf16 (PyTorch NCT convention; feed bf16
                 from the producer for the memory-bound ~2x win)
    W: (C, H)   b: (H,)   v: (H,)
    returns: (B, C) float32
    """
    B, C, T = feature_map.shape
    Cw, H = W.shape
    assert Cw == C, (Cw, C)

    in_itemsize = jnp.dtype(feature_map.dtype).itemsize
    budget, vmem_cap, min_steps = _tpu_generation_info()
    if block_b is None:
        block_b = _pick_block_b(B, C, T, H, in_itemsize,
                                budget=budget, min_steps=min_steps)
    if B % block_b != 0:
        raise ValueError(f"block_b={block_b} must divide B={B}")
    if block_b != B and block_b % 8 != 0:
        raise ValueError(
            f"block_b={block_b} must be a multiple of 8 (or equal to B={B}) "
            "for a dense (Bt, C) output block")
    grid = (B // block_b,)

    # Only tiny weight-side reshapes happen on the host/XLA side; the large
    # (B, C, T) tensor is consumed in its native layout (no extra HBM pass,
    # no wrapper-side dtype cast).
    wt = jnp.asarray(W, jnp.float32).T               # (H, C)
    b2 = jnp.asarray(b, jnp.float32).reshape(H, 1)
    v2 = jnp.asarray(v, jnp.float32).reshape(H, 1)

    # VMEM limit sized from the full per-step footprint (I/O double buffers
    # plus in-kernel intermediates) with headroom, capped per generation.
    est = _block_vmem_bytes(block_b, C, T, H, in_itemsize)
    vmem_limit = int(min(max(est + (8 << 20), 32 << 20), vmem_cap))

    grid_spec = pltpu.PrefetchScalarGridSpec(
        num_scalar_prefetch=0,
        grid=grid,
        in_specs=[
            pl.BlockSpec((block_b, C, T), lambda i: (i, 0, 0)),  # fused batch slab
            pl.BlockSpec((H, C), lambda i: (0, 0)),              # shared weights
            pl.BlockSpec((H, 1), lambda i: (0, 0)),
            pl.BlockSpec((H, 1), lambda i: (0, 0)),
        ],
        out_specs=pl.BlockSpec((block_b, C), lambda i: (i, 0)),   # dense (Bt, C)
    )

    return pl.pallas_call(
        _ffa_kernel,
        out_shape=jax.ShapeDtypeStruct((B, C), jnp.float32),
        grid_spec=grid_spec,
        compiler_params=pltpu.CompilerParams(
            dimension_semantics=("parallel",),
            vmem_limit_bytes=vmem_limit,
        ),
    )(feature_map, wt, b2, v2)


# ----------------------------------------------------------------------------
# Pure-JAX reference (same math)
# ----------------------------------------------------------------------------
def _reference(feature_map, W, b, v):
    x = jnp.transpose(feature_map, (0, 2, 1)).astype(jnp.float32)  # (B, T, C)
    h = jnp.tanh(jnp.einsum("btc,ch->bth", x, W) + b)              # (B, T, H)
    e = jnp.einsum("bth,h->bt", h, v)                              # (B, T)
    a = jax.nn.softmax(e, axis=1)                                  # (B, T)
    return jnp.einsum("bt,btc->bc", a, x)                          # (B, C)


if __name__ == "__main__":
    # Small shapes consistent with the module: B x C x T, hidden H.
    # B=16 -> an 8-row batch block and a >= 2-step parallel grid.
    B, C, T, H = 16, 128, 64, 32

    key = jax.random.PRNGKey(0)
    k_x, k_w, k_b, k_v = jax.random.split(key, 4)

    # f32 demo input so the check against the f32 reference is tight; the
    # kernel also accepts bf16 feature maps (cast at the producer) for the
    # HBM-bandwidth-bound ~2x win.
    feature_map = jax.random.normal(k_x, (B, C, T), dtype=jnp.float32)
    W = jax.random.normal(k_w, (C, H), dtype=jnp.float32) * 0.1
    b = jax.random.normal(k_b, (H,), dtype=jnp.float32) * 0.1
    v = jax.random.normal(k_v, (H,), dtype=jnp.float32) * 0.1

    out = jax.block_until_ready(multi_head_ffa(feature_map, W, b, v))
    ref = _reference(feature_map, W, b, v)

    assert out.shape == (B, C)
    max_err = float(jnp.max(jnp.abs(out - ref)))
    # Tolerance slightly looser than a pure-f32 path because the final
    # normalization uses the EUP approximate reciprocal (per perf review).
    assert jnp.allclose(out, ref, atol=2e-3, rtol=2e-3), max_err

    print("KERNEL_OK")
</pallas_src>

<mosaic_0001>
module attributes {stable_mosaic.version = 11 : i64} {
  func.func @_ffa_kernel(%arg0: i32, %arg1: memref<8x128x64xf32, #tpu.memory_space<vmem>>, %arg2: memref<32x128xf32, #tpu.memory_space<vmem>>, %arg3: memref<32x1xf32, #tpu.memory_space<vmem>>, %arg4: memref<32x1xf32, #tpu.memory_space<vmem>>, %arg5: memref<8x128xf32, #tpu.memory_space<vmem>>) attributes {dimension_semantics = [#tpu.dimension_semantics<parallel>], iteration_bounds = array<i64: 2>, scalar_prefetch = 0 : i64, scratch_operands = 0 : i64, tpu.core_type = #tpu.core_type<tc>, window_params = [{transform_indices = @transform_0, window_bounds = array<i64: 8, 128, 64>}, {pipeline_mode = #tpu.pipeline_mode<synchronous>, transform_indices = @transform_1, window_bounds = array<i64: 32, 128>}, {pipeline_mode = #tpu.pipeline_mode<synchronous>, transform_indices = @transform_2, window_bounds = array<i64: 32, 1>}, {pipeline_mode = #tpu.pipeline_mode<synchronous>, transform_indices = @transform_3, window_bounds = array<i64: 32, 1>}, {transform_indices = @transform_4, window_bounds = array<i64: 8, 128>}]} {
    %c0 = arith.constant 0 : index
    %c0_0 = arith.constant 0 : index
    %c0_1 = arith.constant 0 : index
    %0 = vector.load %arg1[%c0, %c0_0, %c0_1] : memref<8x128x64xf32, #tpu.memory_space<vmem>>, vector<8x128x64xf32>
    %c0_2 = arith.constant 0 : index
    %c0_3 = arith.constant 0 : index
    %1 = vector.load %arg2[%c0_2, %c0_3] : memref<32x128xf32, #tpu.memory_space<vmem>>, vector<32x128xf32>
    %2 = vector.shape_cast %1 : vector<32x128xf32> to vector<1x32x128xf32>
    %3 = vector.shape_cast %2 : vector<1x32x128xf32> to vector<1x32x128xf32>
    %4 = vector.broadcast %3 : vector<1x32x128xf32> to vector<8x32x128xf32>
    "tpu.trace_start"() <{level = 10 : i32, message = "bhc,bct->bht"}> : () -> ()
    %cst = arith.constant dense<0.000000e+00> : vector<8x32x64xf32>
    %5 = tpu.matmul %4, %0, %cst {dimension_numbers = #tpu.dot_dimension_numbers<[2], [1], [1], [2], [0, 0, 0, 1, 1, 2], [0], [0]>} : vector<8x32x128xf32>, vector<8x128x64xf32>, vector<8x32x64xf32> -> vector<8x32x64xf32>
    "tpu.trace_stop"() : () -> ()
    %c0_4 = arith.constant 0 : index
    %c0_5 = arith.constant 0 : index
    %6 = vector.load %arg3[%c0_4, %c0_5] : memref<32x1xf32, #tpu.memory_space<vmem>>, vector<32x1xf32>
    %7 = vector.shape_cast %6 : vector<32x1xf32> to vector<1x32x1xf32>
    %8 = vector.broadcast %7 : vector<1x32x1xf32> to vector<8x32x64xf32>
    %9 = arith.addf %5, %8 : vector<8x32x64xf32>
    %10 = math.tanh %9 : vector<8x32x64xf32>
    %c0_6 = arith.constant 0 : index
    %c0_7 = arith.constant 0 : index
    %11 = vector.load %arg4[%c0_6, %c0_7] : memref<32x1xf32, #tpu.memory_space<vmem>>, vector<32x1xf32>
    %12 = vector.shape_cast %11 : vector<32x1xf32> to vector<1x32x1xf32>
    %13 = vector.broadcast %12 : vector<1x32x1xf32> to vector<8x32x64xf32>
    %14 = arith.mulf %10, %13 : vector<8x32x64xf32>
    %cst_8 = arith.constant dense<0.000000e+00> : vector<8x64xf32>
    %15 = vector.multi_reduction <add>, %14, %cst_8 [1] : vector<8x32x64xf32> to vector<8x64xf32>
    %16 = vector.shape_cast %15 : vector<8x64xf32> to vector<8x1x64xf32>
    %cst_9 = arith.constant dense<0xFF800000> : vector<8x1xf32>
    %17 = vector.multi_reduction <maximumf>, %16, %cst_9 [2] : vector<8x1x64xf32> to vector<8x1xf32>
    %18 = vector.shape_cast %17 : vector<8x1xf32> to vector<8x1x1xf32>
    %19 = vector.broadcast %18 : vector<8x1x1xf32> to vector<8x1x64xf32>
    %20 = arith.subf %16, %19 : vector<8x1x64xf32>
    %21 = math.exp %20 : vector<8x1x64xf32>
    %cst_10 = arith.constant dense<0.000000e+00> : vector<8x1xf32>
    %22 = vector.multi_reduction <add>, %21, %cst_10 [2] : vector<8x1x64xf32> to vector<8x1xf32>
    %23 = vector.shape_cast %22 : vector<8x1xf32> to vector<8x1x1xf32>
    %24 = vector.broadcast %21 : vector<8x1x64xf32> to vector<8x128x64xf32>
    %25 = arith.mulf %0, %24 : vector<8x128x64xf32>
    %cst_11 = arith.constant dense<0.000000e+00> : vector<8x128xf32>
    %26 = vector.multi_reduction <add>, %25, %cst_11 [2] : vector<8x128x64xf32> to vector<8x128xf32>
    %27 = tpu.reciprocal %23 {approx = true} : vector<8x1x1xf32> -> vector<8x1x1xf32>
    %28 = vector.shape_cast %27 : vector<8x1x1xf32> to vector<8x1xf32>
    %29 = vector.broadcast %28 : vector<8x1xf32> to vector<8x128xf32>
    %30 = arith.mulf %26, %29 : vector<8x128xf32>
    %c0_12 = arith.constant 0 : index
    %c0_13 = arith.constant 0 : index
    %31 = vector.load %arg5[%c0_12, %c0_13] : memref<8x128xf32, #tpu.memory_space<vmem>>, vector<8x128xf32>
    tpu.vector_store %arg5[%c0_12, %c0_13], %30 {strides = array<i32>} : memref<8x128xf32, #tpu.memory_space<vmem>>, vector<8x128xf32>,
    return
  }
  func.func @transform_0(%arg0: i32) -> (i32, i32, i32) {
    %c0_i32 = arith.constant 0 : i32
    %c0_i32_0 = arith.constant 0 : i32
    %c0_i32_1 = arith.constant 0 : i32
    return %arg0, %c0_i32, %c0_i32_0 : i32, i32, i32
  }
  func.func @transform_1(%arg0: i32) -> (i32, i32) {
    %c0_i32 = arith.constant 0 : i32
    %c0_i32_0 = arith.constant 0 : i32
    %c0_i32_1 = arith.constant 0 : i32
    return %c0_i32, %c0_i32_0 : i32, i32
  }
  func.func @transform_2(%arg0: i32) -> (i32, i32) {
    %c0_i32 = arith.constant 0 : i32
    %c0_i32_0 = arith.constant 0 : i32
    %c0_i32_1 = arith.constant 0 : i32
    return %c0_i32, %c0_i32_0 : i32, i32
  }
  func.func @transform_3(%arg0: i32) -> (i32, i32) {
    %c0_i32 = arith.constant 0 : i32
    %c0_i32_0 = arith.constant 0 : i32
    %c0_i32_1 = arith.constant 0 : i32
    return %c0_i32, %c0_i32_0 : i32, i32
  }
  func.func @transform_4(%arg0: i32) -> (i32, i32) {
    %c0_i32 = arith.constant 0 : i32
    %c0_i32_0 = arith.constant 0 : i32
    return %arg0, %c0_i32 : i32, i32
  }
}

</mosaic_0001>

<bundles_post_ra>
// kernel: tpu_custom_call.1
= control target key start
LH: loop header
LB: loop body
LE: loop exit
PB: predicated region body
PF: predicated region fallthrough
CT: control target
= control target key end

     0   :  { %9 = vsyncpa [#allocation3], 0  ;;  %s3699_s0 = inlined_call_operand.vmem [shape: f32[16,128,64], index: 0, kind: input, shape index: {}]   ;;  %s3700_s1 = inlined_call_operand.vmem [shape: f32[32,128], index: 1, kind: input, shape index: {}]   ;;  %s3701_s2 = inlined_call_operand.vmem [shape: f32[32,1], index: 2, kind: input, shape index: {}]   ;;  %s3702_s3 = inlined_call_operand.vmem [shape: f32[32,1], index: 3, kind: input, shape index: {}]   ;;  %s3703_s4 = inlined_call_operand.hbm [shape: f32[16,128], index: 4, kind: output, shape index: {}]  }
   0x1   :  { %11 = vsyncpa [#allocation3 + $0x1], 0  ;;  %s2369_s15 = smov 0   ;;  %s2371_s16 = smov 0  }
   0x2   :  { %s2373_s17 = smov 0   ;;  %s2375_s18 = smov 0  }
   0x3 LB: > { %s2000_s19 = sadd.s32 4294967295, %s2341_s18   ;;  %s2001_s20 = sadd.s32 4294967294, %s2341_s18   ;;  %s2341_s18 = sphi %s2375_s18, %s3719_s18   ;;  %s2337_s17 = sphi %s2373_s17, %s3718_s17   ;;  %s2333_s16 = sphi %s2371_s16, %s3717_s16   ;;  %s2329_s15 = sphi %s2369_s15, %s3716_s15  }
   0x4   : > { %s2392_s21 = sadd.s32 1, %s2341_s18   ;;  %s113_s22 = sadd.s32 1, %s2337_s17 }
   0x5   : > { %s110_s23 = ssub.s32 %s2341_s18, %s2392_s21  ;;  %p123_p0 = scmp.ne.s32.totalorder %s2337_s17, %s2333_s16 }
   0x6   : > { %p111_p1 = scmp.eq.s32.totalorder %s110_s23, 0  ;;  %p124_p2 = scmp.eq.s32.totalorder %s2000_s19, 1 }
   0x7   : > { %p129_p3 = scmp.ne.s32.totalorder %s2333_s16, %s2329_s15  ;;  %p130_p4 = scmp.eq.s32.totalorder %s2001_s20, 1 }
   0x8   : > { %s2402_s24 = scalar_select %p111_p1, %s2337_s17, %s113_s22  }
   0x9   : > { %p2404_p5 = por %p124_p2, %p123_p0  ;;  %p2408_p6 = por %p130_p4, %p129_p3 }
   0xa   : > { %p2004_p7 = scmp.ge.s32.totalorder %s2341_s18, 1  ;;  %p167_p8 = scmp.lt.s32.totalorder %s2341_s18, 3 }
   0xc   : > { %p168_p9 = pnand %p2004_p7, %p167_p8 }
   0xd   : > { %s2414_s27 = sshll.u32 (!%p168_p9), %s2000_s19, 3  ;;  %s2299_s10 = scalar_lea.hbm (!%p168_p9), %s3703_s4, 16 }
   0xe   : > { %171 = sbr.rel (%p168_p9) target bundleno = 856 (0x358), region = 36  ;;  %p195_p10 = scmp.lt.s32.totalorder (!%p168_p9), %s2414_s27, 15 }
   0xf   : > { %s1937_s23 = scalar_lea.hbm (!%p168_p9), %s3703_s4, %s2414_s27 }
  0x10   : > { %s1941_s30 = sshll.u32 (!%p168_p9), %s1937_s23, 4  ;;  %s1942_s30 = int_to_ptr.hbm [resolvable:$true] %s1941_s30 }
  0x11   : > { %s2293_s5 = sshra.s32 (!%p168_p9), %s1942_s30, 4  ;;  %s2294_s5 = int_to_ptr.hbm [resolvable:$true] %s2293_s5 }
  0x12   : > { %s2295_s7 = scalar_lea.hbm (!%p168_p9), %s2294_s5, 8  ;;  %p2300_p0 = scmp.lt.s32.totalorder (!%p168_p9), %s2294_s5, %s3703_s4 }
  0x13   : > { %s196_s28 = scalar_select %p195_p10, %s2414_s27, 15  ;;  %vm677_vm0 = vcmask 523264   ;;  %vm1635_vm1 = vcmask 130112   ;;  %vm1639_vm2 = vcmask 195712   ;;  %vm1643_vm3 = vcmask 261312  }
  0x14   : > { %vm1647_vm4 = vcmask 326912   ;;  %vm1651_vm5 = vcmask 392512   ;;  %vm1655_vm6 = vcmask 458112   ;;  %vm1659_vm7 = vcmask 523712   ;;  %p2296_p11 = scmp.ne.s32.totalorder %s2294_s5, %s2295_s7  ;;  %p2301_p1 = scmp.lt.s32.totalorder %s2299_s10, %s2295_s7 }
  0x15   : > { %s2013_s29 = sshll.u32 %s196_s28, 7  ;;  %vm1663_vm8 = vcmask 589312   ;;  %vm1667_vm9 = vcmask 654912   ;;  %vm1671_vm10 = vcmask 720512   ;;  %vm1675_vm11 = vcmask 786112  }
  0x16   : > { %s2421_s6 = scalar_lea.vmem %s3699_s0, %s2013_s29  ;;  %vm3705_vm12 = vcmask 851712   ;;  %vm3704_vm13 = vcmask 917312   ;;  %vm1687_vm14 = vcmask 982912   ;;  %vm1691_vm15 = vcmask 1048512   ;;  %p2297_p12 = pnand %p2296_p11, %p2404_p5 }
  0x17   : > { %v216_v0 = vld [vmem:[%s2421_s6 + $0x78] sm:$0xff]  ;;  %v215_v4 = vld [vmem:[%s2421_s6 + $0x70] sm:$0xff]  ;;  %v214_v8 = vld [vmem:[%s2421_s6 + $0x68] sm:$0xff]  ;;  %p2302_p2 = por %p2301_p1, %p2300_p0 }
  0x18   : > { %v232_v1 = vld [vmem:[%s2421_s6 + $0xf8] sm:$0xff]  ;;  %357 = vmatpush.msra.mxu0 %v216_v0  ;;  %v231_v5 = vld [vmem:[%s2421_s6 + $0xf0] sm:$0xff]  ;;  %v230_v9 = vld [vmem:[%s2421_s6 + $0xe8] sm:$0xff]  ;;  %p2298_p13 = pneg %p2297_p12 }
  0x19   : > { %v248_v2 = vld [vmem:[%s2421_s6 + $0x178] sm:$0xff]  ;;  %386 = vmatpush.msra.mxu1 %v232_v1  ;;  %v247_v6 = vld [vmem:[%s2421_s6 + $0x170] sm:$0xff]  ;;  %v246_v10 = vld [vmem:[%s2421_s6 + $0x168] sm:$0xff] }
  0x1a   : > { %v264_v3 = vld [vmem:[%s2421_s6 + $0x1f8] sm:$0xff]  ;;  %415 = vmatpush.msra.mxu2 %v248_v2  ;;  %v263_v7 = vld [vmem:[%s2421_s6 + $0x1f0] sm:$0xff]  ;;  %358 = vmatpush.msra.mxu0 %v215_v4  ;;  %v262_v11 = vld [vmem:[%s2421_s6 + $0x1e8] sm:$0xff]  ;;  %p2303_p3 = pnand %p2302_p2, %p2298_p13 }
  0x1b   : > { %444 = vmatpush.msra.mxu3 %v264_v3  ;;  %387 = vmatpush.msra.mxu1 %v231_v5  ;;  %v213_v12 = vld [vmem:[%s2421_s6 + $0x60] sm:$0xff]  ;;  %v212_v16 = vld [vmem:[%s2421_s6 + $0x58] sm:$0xff]  ;;  %v211_v20 = vld [vmem:[%s2421_s6 + $0x50] sm:$0xff] }
  0x1c   : > { %416 = vmatpush.msra.mxu2 %v247_v6  ;;  %v229_v13 = vld [vmem:[%s2421_s6 + $0xe0] sm:$0xff]  ;;  %359 = vmatpush.msra.mxu0 %v214_v8  ;;  %v228_v17 = vld [vmem:[%s2421_s6 + $0xd8] sm:$0xff]  ;;  %v227_v21 = vld [vmem:[%s2421_s6 + $0xd0] sm:$0xff] }
  0x1d   : > { %445 = vmatpush.msra.mxu3 %v263_v7  ;;  %388 = vmatpush.msra.mxu1 %v230_v9  ;;  %v245_v14 = vld [vmem:[%s2421_s6 + $0x160] sm:$0xff]  ;;  %v244_v18 = vld [vmem:[%s2421_s6 + $0x158] sm:$0xff]  ;;  %v243_v22 = vld [vmem:[%s2421_s6 + $0x150] sm:$0xff] }
  0x1e   : > { %v261_v15 = vld [vmem:[%s2421_s6 + $0x1e0] sm:$0xff]  ;;  %417 = vmatpush.msra.mxu2 %v246_v10  ;;  %360 = vmatpush.msra.mxu0 %v213_v12  ;;  %v260_v19 = vld [vmem:[%s2421_s6 + $0x1d8] sm:$0xff]  ;;  %v259_v23 = vld [vmem:[%s2421_s6 + $0x1d0] sm:$0xff] }
  0x1f   : > { %446 = vmatpush.msra.mxu3 %v262_v11  ;;  %389 = vmatpush.msra.mxu1 %v229_v13  ;;  %v210_v24 = vld [vmem:[%s2421_s6 + $0x48] sm:$0xff]  ;;  %v209_v28 = vld [vmem:[%s2421_s6 + $0x40] sm:$0xff]  ;;  %v208_v32 = vld [vmem:[%s2421_s6 + $0x38] sm:$0xff] }
  0x20   : > { %418 = vmatpush.msra.mxu2 %v245_v14  ;;  %361 = vmatpush.msra.mxu0 %v212_v16  ;;  %v226_v25 = vld [vmem:[%s2421_s6 + $0xc8] sm:$0xff]  ;;  %v225_v29 = vld [vmem:[%s2421_s6 + $0xc0] sm:$0xff]  ;;  %v224_v33 = vld [vmem:[%s2421_s6 + $0xb8] sm:$0xff] }
  0x21   : > { %447 = vmatpush.msra.mxu3 %v261_v15  ;;  %390 = vmatpush.msra.mxu1 %v228_v17  ;;  %v242_v26 = vld [vmem:[%s2421_s6 + $0x148] sm:$0xff]  ;;  %v241_v30 = vld [vmem:[%s2421_s6 + $0x140] sm:$0xff]  ;;  %v240_v34 = vld [vmem:[%s2421_s6 + $0x138] sm:$0xff] }
  0x22   : > { %419 = vmatpush.msra.mxu2 %v244_v18  ;;  %362 = vmatpush.msra.mxu0 %v211_v20  ;;  %v258_v27 = vld [vmem:[%s2421_s6 + $0x1c8] sm:$0xff]  ;;  %v257_v31 = vld [vmem:[%s2421_s6 + $0x1c0] sm:$0xff]  ;;  %v256_v35 = vld [vmem:[%s2421_s6 + $0x1b8] sm:$0xff]  ;;  %v2343_v18 = vmov 0  }
  0x23   : > { %448 = vmatpush.msra.mxu3 %v260_v19  ;;  %391 = vmatpush.msra.mxu1 %v227_v21  ;;  %v207_v36 = vld [vmem:[%s2421_s6 + $0x30] sm:$0xff]  ;;  %v206_v40 = vld [vmem:[%s2421_s6 + $0x28] sm:$0xff]  ;;  %v205_v44 = vld [vmem:[%s2421_s6 + $0x20] sm:$0xff] }
  0x24   : > { %420 = vmatpush.msra.mxu2 %v243_v22  ;;  %363 = vmatpush.msra.mxu0 %v210_v24  ;;  %v223_v37 = vld [vmem:[%s2421_s6 + $0xb0] sm:$0xff]  ;;  %v222_v41 = vld [vmem:[%s2421_s6 + $0xa8] sm:$0xff]  ;;  %v221_v45 = vld [vmem:[%s2421_s6 + $0xa0] sm:$0xff] }
  0x25   : > { %449 = vmatpush.msra.mxu3 %v259_v23  ;;  %392 = vmatpush.msra.mxu1 %v226_v25  ;;  %v239_v38 = vld [vmem:[%s2421_s6 + $0x130] sm:$0xff]  ;;  %v238_v42 = vld [vmem:[%s2421_s6 + $0x128] sm:$0xff]  ;;  %v237_v46 = vld [vmem:[%s2421_s6 + $0x120] sm:$0xff] }
  0x26   : > { %421 = vmatpush.msra.mxu2 %v242_v26  ;;  %364 = vmatpush.msra.mxu0 %v209_v28  ;;  %v255_v39 = vld [vmem:[%s2421_s6 + $0x1b0] sm:$0xff]  ;;  %v254_v43 = vld [vmem:[%s2421_s6 + $0x1a8] sm:$0xff]  ;;  %v253_v47 = vld [vmem:[%s2421_s6 + $0x1a0] sm:$0xff] }
  0x27   : > { %450 = vmatpush.msra.mxu3 %v258_v27  ;;  %393 = vmatpush.msra.mxu1 %v225_v29  ;;  %v204_v48 = vld [vmem:[%s2421_s6 + $0x18] sm:$0xff]  ;;  %v203_v52 = vld [vmem:[%s2421_s6 + $0x10] sm:$0xff]  ;;  %v2480_v56 = vld [vmem:[%s2421_s6 + $0x8] sm:$0xff] }
  0x28   : > { %422 = vmatpush.msra.mxu2 %v241_v30  ;;  %365 = vmatpush.msra.mxu0 %v208_v32  ;;  %v220_v49 = vld [vmem:[%s2421_s6 + $0x98] sm:$0xff]  ;;  %v219_v53 = vld [vmem:[%s2421_s6 + $0x90] sm:$0xff]  ;;  %v218_v57 = vld [vmem:[%s2421_s6 + $0x88] sm:$0xff] }
  0x29   : > { %451 = vmatpush.msra.mxu3 %v257_v31  ;;  %394 = vmatpush.msra.mxu1 %v224_v33  ;;  %v236_v50 = vld [vmem:[%s2421_s6 + $0x118] sm:$0xff]  ;;  %v235_v54 = vld [vmem:[%s2421_s6 + $0x110] sm:$0xff]  ;;  %v234_v58 = vld [vmem:[%s2421_s6 + $0x108] sm:$0xff] }
  0x2a   : > { %423 = vmatpush.msra.mxu2 %v240_v34  ;;  %366 = vmatpush.msra.mxu0 %v207_v36  ;;  %v252_v51 = vld [vmem:[%s2421_s6 + $0x198] sm:$0xff]  ;;  %v251_v55 = vld [vmem:[%s2421_s6 + $0x190] sm:$0xff]  ;;  %v250_v59 = vld [vmem:[%s2421_s6 + $0x188] sm:$0xff] }
  0x2b   : > { %452 = vmatpush.msra.mxu3 %v256_v35  ;;  %395 = vmatpush.msra.mxu1 %v223_v37  ;;  %v2486_v60 = vld [vmem:[%s2421_s6] sm:$0xff]  ;;  %v280_v1 = vld [vmem:[%s2421_s6 + $0x278] sm:$0xff]  ;;  %v279_v5 = vld [vmem:[%s2421_s6 + $0x270] sm:$0xff] }
  0x2c   : > { %424 = vmatpush.msra.mxu2 %v239_v38  ;;  %367 = vmatpush.msra.mxu0 %v206_v40  ;;  %v217_v61 = vld [vmem:[%s2421_s6 + $0x80] sm:$0xff]  ;;  %v296_v2 = vld [vmem:[%s2421_s6 + $0x2f8] sm:$0xff]  ;;  %v295_v6 = vld [vmem:[%s2421_s6 + $0x2f0] sm:$0xff] }
  0x2d   : > { %453 = vmatpush.msra.mxu3 %v255_v39  ;;  %396 = vmatpush.msra.mxu1 %v222_v41  ;;  %v233_v62 = vld [vmem:[%s2421_s6 + $0x100] sm:$0xff]  ;;  %v312_v3 = vld [vmem:[%s2421_s6 + $0x378] sm:$0xff]  ;;  %v311_v7 = vld [vmem:[%s2421_s6 + $0x370] sm:$0xff] }
  0x2e   : > { %425 = vmatpush.msra.mxu2 %v238_v42  ;;  %368 = vmatpush.msra.mxu0 %v205_v44  ;;  %v249_v63 = vld [vmem:[%s2421_s6 + $0x180] sm:$0xff]  ;;  %v328_v4 = vld [vmem:[%s2421_s6 + $0x3f8] sm:$0xff]  ;;  %v327_v8 = vld [vmem:[%s2421_s6 + $0x3f0] sm:$0xff] }
  0x2f   : > { %454 = vmatpush.msra.mxu3 %v254_v43  ;;  %397 = vmatpush.msra.mxu1 %v221_v45  ;;  %v2495_v0 = vld [vmem:[%s3700_s1] sm:$0xff]  ;;  %v278_v9 = vld [vmem:[%s2421_s6 + $0x268] sm:$0xff]  ;;  %v276_v20 = vld [vmem:[%s2421_s6 + $0x258] sm:$0xff] }
  0x30   : > { %426 = vmatpush.msra.mxu2 %v237_v46  ;;  %369 = vmatpush.msra.mxu0 %v204_v48  ;;  %v294_v10 = vld [vmem:[%s2421_s6 + $0x2e8] sm:$0xff]  ;;  %v277_v13 = vld [vmem:[%s2421_s6 + $0x260] sm:$0xff]  ;;  %v292_v21 = vld [vmem:[%s2421_s6 + $0x2d8] sm:$0xff] }
  0x31   : > { %455 = vmatpush.msra.mxu3 %v253_v47  ;;  %398 = vmatpush.msra.mxu1 %v220_v49  ;;  %v310_v11 = vld [vmem:[%s2421_s6 + $0x368] sm:$0xff]  ;;  %v333_v14 = vld [vmem:[%s3701_s2] sm:$0xff]  ;;  %v308_v22 = vld [vmem:[%s2421_s6 + $0x358] sm:$0xff] }
  0x32   : > { %427 = vmatpush.msra.mxu2 %v236_v50  ;;  %370 = vmatpush.msra.mxu0 %v203_v52  ;;  %v326_v12 = vld [vmem:[%s2421_s6 + $0x3e8] sm:$0xff]  ;;  %v293_v15 = vld [vmem:[%s2421_s6 + $0x2e0] sm:$0xff]  ;;  %v324_v23 = vld [vmem:[%s2421_s6 + $0x3d8] sm:$0xff] }
  0x33   : > { %456 = vmatpush.msra.mxu3 %v252_v51  ;;  %399 = vmatpush.msra.mxu1 %v219_v53  ;;  %v309_v16 = vld [vmem:[%s2421_s6 + $0x360] sm:$0xff]  ;;  %v2525_v19 = vld [vmem:[%s3700_s1 + $0x8] sm:$0xff]  ;;  %v275_v24 = vld [vmem:[%s2421_s6 + $0x250] sm:$0xff] }
  0x34   : > { %428 = vmatpush.msra.mxu2 %v235_v54  ;;  %371 = vmatpush.msra.mxu0 %v2480_v56  ;;  %v325_v17 = vld [vmem:[%s2421_s6 + $0x3e0] sm:$0xff]  ;;  %v335_v25 = vld [vmem:[%s3701_s2 + $0x10] sm:$0xff]  ;;  %v274_v29 = vld [vmem:[%s2421_s6 + $0x248] sm:$0xff] }
  0x35   : > { %457 = vmatpush.msra.mxu3 %v251_v55  ;;  %400 = vmatpush.msra.mxu1 %v218_v57  ;;  %v291_v26 = vld [vmem:[%s2421_s6 + $0x2d0] sm:$0xff]  ;;  %v290_v30 = vld [vmem:[%s2421_s6 + $0x2c8] sm:$0xff]  ;;  %v273_v34 = vld [vmem:[%s2421_s6 + $0x240] sm:$0xff] }
  0x36   : > { %429 = vmatpush.msra.mxu2 %v234_v58  ;;  %372 = vmatpush.msra.mxu0 %v2486_v60  ;;  %v307_v27 = vld [vmem:[%s2421_s6 + $0x350] sm:$0xff]  ;;  %v306_v31 = vld [vmem:[%s2421_s6 + $0x348] sm:$0xff]  ;;  %v289_v35 = vld [vmem:[%s2421_s6 + $0x2c0] sm:$0xff] }
  0x37   : > { %458 = vmatpush.msra.mxu3 %v250_v59  ;;  %401 = vmatpush.msra.mxu1 %v217_v61  ;;  %v323_v28 = vld [vmem:[%s2421_s6 + $0x3d0] sm:$0xff]  ;;  %v322_v32 = vld [vmem:[%s2421_s6 + $0x3c8] sm:$0xff]  ;;  %v305_v36 = vld [vmem:[%s2421_s6 + $0x340] sm:$0xff] }
  0x38   : > { %430 = vmatpush.msra.mxu2 %v233_v62  ;;  %373 = vmatmul.f32.vlgmr.msra.gmra.mxu0 %v2495_v0  ;;  %v334_v33 = vld [vmem:[%s3701_s2 + $0x8] sm:$0xff]  ;;  %v321_v37 = vld [vmem:[%s2421_s6 + $0x3c0] sm:$0xff]  ;;  %v2557_v38 = vld [vmem:[%s3700_s1 + $0x10] sm:$0xff] }
  0x39   : > { %459 = vmatpush.msra.mxu3 %v249_v63  ;;  %402 = vmatmul.f32.vlgmr.msra.gmra.mxu1 %v2495_v0  ;;  %v272_v39 = vld [vmem:[%s2421_s6 + $0x238] sm:$0xff]  ;;  %v271_v44 = vld [vmem:[%s2421_s6 + $0x230] sm:$0xff]  ;;  %v270_v48 = vld [vmem:[%s2421_s6 + $0x228] sm:$0xff] }
  0x3a   : > { %431 = vmatmul.f32.vlgmr.msra.gmra.mxu2 %v2495_v0  ;;  %460 = vmatmul.f32.vlgmr.msra.gmra.mxu3 %v2495_v0  ;;  %v288_v40 = vld [vmem:[%s2421_s6 + $0x2b8] sm:$0xff]  ;;  %v287_v45 = vld [vmem:[%s2421_s6 + $0x2b0] sm:$0xff]  ;;  %v286_v49 = vld [vmem:[%s2421_s6 + $0x2a8] sm:$0xff] }
  0x3b   : > { %473 = vmatpush.msrb.mxu0 %v280_v1  ;;  %502 = vmatpush.msrb.mxu1 %v296_v2  ;;  %v304_v41 = vld [vmem:[%s2421_s6 + $0x338] sm:$0xff]  ;;  %v303_v46 = vld [vmem:[%s2421_s6 + $0x330] sm:$0xff]  ;;  %v302_v50 = vld [vmem:[%s2421_s6 + $0x328] sm:$0xff] }
  0x3c   : > { %531 = vmatpush.msrb.mxu2 %v312_v3  ;;  %560 = vmatpush.msrb.mxu3 %v328_v4  ;;  %v320_v42 = vld [vmem:[%s2421_s6 + $0x3b8] sm:$0xff]  ;;  %v319_v47 = vld [vmem:[%s2421_s6 + $0x3b0] sm:$0xff]  ;;  %v318_v51 = vld [vmem:[%s2421_s6 + $0x3a8] sm:$0xff] }
  0x3d   : > { %474 = vmatpush.msrb.mxu0 %v279_v5  ;;  %503 = vmatpush.msrb.mxu1 %v295_v6  ;;  %v336_v43 = vld [vmem:[%s3701_s2 + $0x18] sm:$0xff]  ;;  %v623_v52 = vld [vmem:[%s3702_s3 + $0x10] sm:$0xff]  ;;  %v269_v53 = vld [vmem:[%s2421_s6 + $0x220] sm:$0xff] }
  0x3e   : > { %532 = vmatpush.msrb.mxu2 %v311_v7  ;;  %561 = vmatpush.msrb.mxu3 %v327_v8  ;;  %v285_v54 = vld [vmem:[%s2421_s6 + $0x2a0] sm:$0xff]  ;;  %v2588_v58 = vld [vmem:[%s3700_s1 + $0x18] sm:$0xff]  ;;  %v267_v2 = vld [vmem:[%s2421_s6 + $0x210] sm:$0xff] }
  0x3f   : > { %475 = vmatpush.msrb.mxu0 %v278_v9  ;;  %504 = vmatpush.msrb.mxu1 %v294_v10  ;;  %v301_v55 = vld [vmem:[%s2421_s6 + $0x320] sm:$0xff]  ;;  %v268_v59 = vld [vmem:[%s2421_s6 + $0x218] sm:$0xff]  ;;  %v283_v3 = vld [vmem:[%s2421_s6 + $0x290] sm:$0xff] }
  0x40   : > { %533 = vmatpush.msrb.mxu2 %v310_v11  ;;  %562 = vmatpush.msrb.mxu3 %v326_v12  ;;  %v317_v57 = vld [vmem:[%s2421_s6 + $0x3a0] sm:$0xff]  ;;  %v284_v61 = vld [vmem:[%s2421_s6 + $0x298] sm:$0xff]  ;;  %v299_v4 = vld [vmem:[%s2421_s6 + $0x310] sm:$0xff] }
  0x41   : > { %2054 = vset.pattern.permute.xlu0 %v2343_v18  ;;  %476 = vmatpush.msrb.mxu0 %v277_v13  ;;  %v300_v62 = vld [vmem:[%s2421_s6 + $0x318] sm:$0xff]  ;;  %v315_v5 = vld [vmem:[%s2421_s6 + $0x390] sm:$0xff]  ;;  %v266_v6 = vld [vmem:[%s2421_s6 + $0x208] sm:$0xff] }
  0x42   : > { %339 = vperm.xlu0 %2054, %v333_v14   ;;  %505 = vmatpush.msrb.mxu1 %v293_v15  ;;  %v316_v63 = vld [vmem:[%s2421_s6 + $0x398] sm:$0xff]  ;;  %v282_v7 = vld [vmem:[%s2421_s6 + $0x288] sm:$0xff]  ;;  %v265_v10 = vld [vmem:[%s2421_s6 + $0x200] sm:$0xff] }
  0x43   : > { %534 = vmatpush.msrb.mxu2 %v309_v16  ;;  %563 = vmatpush.msrb.mxu3 %v325_v17  ;;  %v624_v1 = vld [vmem:[%s3702_s3 + $0x18] sm:$0xff]  ;;  %v298_v8 = vld [vmem:[%s2421_s6 + $0x308] sm:$0xff]  ;;  %v281_v11 = vld [vmem:[%s2421_s6 + $0x280] sm:$0xff] }
  0x44   : > { %376 = vmatmul.f32.gmra.mxu0 %v2525_v19  ;;  %405 = vmatmul.f32.gmra.mxu1 %v2525_v19  ;;  %v314_v9 = vld [vmem:[%s2421_s6 + $0x388] sm:$0xff]  ;;  %v297_v12 = vld [vmem:[%s2421_s6 + $0x300] sm:$0xff] }
  0x45   : > { %434 = vmatmul.f32.gmra.mxu2 %v2525_v19  ;;  %463 = vmatmul.f32.gmra.mxu3 %v2525_v19  ;;  %v313_v13 = vld [vmem:[%s2421_s6 + $0x380] sm:$0xff]  ;;  %v622_v15 = vld [vmem:[%s3702_s3 + $0x8] sm:$0xff] }
  0x46   : > { %477 = vmatpush.msrb.mxu0 %v276_v20  ;;  %506 = vmatpush.msrb.mxu1 %v292_v21  ;;  %v621_v14 = vld [vmem:[%s3702_s3] sm:$0xff] }
  0x47   : > { %535 = vmatpush.msrb.mxu2 %v308_v22  ;;  %564 = vmatpush.msrb.mxu3 %v324_v23 }
  0x48   : > { %2055 = vset.pattern.permute.xlu1 %v2343_v18  ;;  %478 = vmatpush.msrb.mxu0 %v275_v24 }
  0x49   : > { %349 = vperm.xlu1 %2055, %v335_v25   ;;  %507 = vmatpush.msrb.mxu1 %v291_v26 }
  0x4a   : > { %536 = vmatpush.msrb.mxu2 %v307_v27  ;;  %565 = vmatpush.msrb.mxu3 %v323_v28 }
  0x4b   : > { %479 = vmatpush.msrb.mxu0 %v274_v29  ;;  %508 = vmatpush.msrb.mxu1 %v290_v30 }
  0x4c   : > { %537 = vmatpush.msrb.mxu2 %v306_v31  ;;  %566 = vmatpush.msrb.mxu3 %v322_v32 }
  0x4d   : > { %344 = vperm.xlu0 %2054, %v334_v33   ;;  %480 = vmatpush.msrb.mxu0 %v273_v34 }
  0x4e   : > { %509 = vmatpush.msrb.mxu1 %v289_v35  ;;  %538 = vmatpush.msrb.mxu2 %v305_v36 }
  0x4f   : > { %567 = vmatpush.msrb.mxu3 %v321_v37  ;;  %379 = vmatmul.f32.gmra.mxu0 %v2557_v38 }
  0x50   : > { %408 = vmatmul.f32.gmra.mxu1 %v2557_v38  ;;  %437 = vmatmul.f32.gmra.mxu2 %v2557_v38 }
  0x51   : > { %466 = vmatmul.f32.gmra.mxu3 %v2557_v38  ;;  %481 = vmatpush.msrb.mxu0 %v272_v39 }
  0x52   : > { %510 = vmatpush.msrb.mxu1 %v288_v40  ;;  %539 = vmatpush.msrb.mxu2 %v304_v41 }
  0x53   : > { %568 = vmatpush.msrb.mxu3 %v320_v42  ;;  %354 = vperm.xlu1 %2055, %v336_v43  }
  0x54   : > { %482 = vmatpush.msrb.mxu0 %v271_v44  ;;  %511 = vmatpush.msrb.mxu1 %v287_v45 }
  0x55   : > { %540 = vmatpush.msrb.mxu2 %v303_v46  ;;  %569 = vmatpush.msrb.mxu3 %v319_v47 }
  0x56   : > { %483 = vmatpush.msrb.mxu0 %v270_v48  ;;  %512 = vmatpush.msrb.mxu1 %v286_v49 }
  0x57   : > { %541 = vmatpush.msrb.mxu2 %v302_v50  ;;  %570 = vmatpush.msrb.mxu3 %v318_v51 }
  0x58   : > { %637 = vperm.xlu0 %2054, %v623_v52   ;;  %484 = vmatpush.msrb.mxu0 %v269_v53 }
  0x59   : > { %513 = vmatpush.msrb.mxu1 %v285_v54  ;;  %542 = vmatpush.msrb.mxu2 %v301_v55 }
  0x5a   : > { %571 = vmatpush.msrb.mxu3 %v317_v57  ;;  %382 = vmatmul.f32.gmra.mxu0 %v2588_v58 }
  0x5b   : > { %411 = vmatmul.f32.gmra.mxu1 %v2588_v58  ;;  %440 = vmatmul.f32.gmra.mxu2 %v2588_v58 }
  0x5c   : > { %469 = vmatmul.f32.gmra.mxu3 %v2588_v58  ;;  %485 = vmatpush.msrb.mxu0 %v268_v59 }
  0x5d   : > { %514 = vmatpush.msrb.mxu1 %v284_v61  ;;  %543 = vmatpush.msrb.mxu2 %v300_v62 }
  0x5e   : > { %572 = vmatpush.msrb.mxu3 %v316_v63  ;;  %642 = vperm.xlu1 %2055, %v624_v1  }
  0x5f   : > { %486 = vmatpush.msrb.mxu0 %v267_v2  ;;  %515 = vmatpush.msrb.mxu1 %v283_v3 }
  0x60   : > { %544 = vmatpush.msrb.mxu2 %v299_v4  ;;  %573 = vmatpush.msrb.mxu3 %v315_v5 }
  0x61   : > { %487 = vmatpush.msrb.mxu0 %v266_v6  ;;  %516 = vmatpush.msrb.mxu1 %v282_v7 }
  0x62   : > { %545 = vmatpush.msrb.mxu2 %v298_v8  ;;  %574 = vmatpush.msrb.mxu3 %v314_v9 }
  0x63   : > { %488 = vmatpush.msrb.mxu0 %v265_v10  ;;  %517 = vmatpush.msrb.mxu1 %v281_v11 }
  0x64   : > { %546 = vmatpush.msrb.mxu2 %v297_v12  ;;  %575 = vmatpush.msrb.mxu3 %v313_v13 }
  0x65   : > { %489 = vmatmul.f32.vlgmr.msrb.gmra.mxu0 %v2495_v0  ;;  %518 = vmatmul.f32.vlgmr.msrb.gmra.mxu1 %v2495_v0 }
  0x66   : > { %547 = vmatmul.f32.vlgmr.msrb.gmra.mxu2 %v2495_v0  ;;  %576 = vmatmul.f32.vlgmr.msrb.gmra.mxu3 %v2495_v0 }
  0x67   : > { %2056 = vset.pattern.permute.xlu2 %v2343_v18 }
  0x68   : > { %627 = vperm.xlu2 %2056, %v621_v14  }
  0x6d   : > { %492 = vmatmul.f32.gmra.mxu0 %v2525_v19  ;;  %521 = vmatmul.f32.gmra.mxu1 %v2525_v19 }
  0x6e   : > { %550 = vmatmul.f32.gmra.mxu2 %v2525_v19  ;;  %579 = vmatmul.f32.gmra.mxu3 %v2525_v19 }
  0x70   : > { %632 = vperm.xlu2 %2056, %v622_v15  }
  0x75   : > { %495 = vmatmul.f32.gmra.mxu0 %v2557_v38  ;;  %524 = vmatmul.f32.gmra.mxu1 %v2557_v38 }
  0x76   : > { %553 = vmatmul.f32.gmra.mxu2 %v2557_v38  ;;  %582 = vmatmul.f32.gmra.mxu3 %v2557_v38 }
  0x7d   : > { %498 = vmatmul.f32.gmra.mxu0 %v2588_v58  ;;  %527 = vmatmul.f32.gmra.mxu1 %v2588_v58 }
  0x7e   : > { %556 = vmatmul.f32.gmra.mxu2 %v2588_v58  ;;  %585 = vmatmul.f32.gmra.mxu3 %v2588_v58 }
  0xb4   : > { %v2636_v18 = vpop.permute.xlu0 %339 }
  0xb5   : > { %v374_v0 = vpop.f32.mrf.mxu0 }
  0xb6   : > { %v403_v16 = vpop.f32.mrf.mxu1  ;;  %v375_v24 = vadd.f32 %v374_v0, %v2636_v18 }
  0xb7   : > { %v404_v25 = vadd.f32 %v403_v16, %v2636_v18 }
  0xb8   : > { %2057 = vtanh.f32 %v375_v24 }
  0xb9   : > { %2059 = vtanh.f32 %v404_v25 }
  0xbb   : > { %v2638_v23 = vpop.permute.xlu1 %349 }
  0xbd   : > { %v432_v17 = vpop.f32.mrf.mxu2  ;;  %v461_v19 = vpop.f32.mrf.mxu3 }
  0xbe   : > { %v433_v35 = vadd.f32 %v432_v17, %v2636_v18  ;;  %v462_v36 = vadd.f32 %v461_v19, %v2636_v18  ;;  %v2058_v39 = vpop.eup %2057 }
  0xbf   : > { %v2642_v26 = vpop.permute.xlu0 %344  ;;  %v2060_v41 = vpop.eup %2059 }
  0xc1   : > { %v377_v20 = vpop.f32.mrf.mxu0  ;;  %v406_v21 = vpop.f32.mrf.mxu1 }
  0xc2   : > { %v378_v28 = vadd.f32 %v377_v20, %v2642_v26  ;;  %v2645_v29 = vpop.permute.xlu2 %627  ;;  %v407_v31 = vadd.f32 %v406_v21, %v2642_v26 }
  0xc3   : > { %v649_v58 = vmul.f32 %v2060_v41, %v2645_v29  ;;  %v645_v63 = vmul.f32 %v2058_v39, %v2645_v29 }
  0xc4   : > { %2061 = vtanh.f32 %v378_v28 }
  0xc5   : > { %2063 = vtanh.f32 %v407_v31  ;;  %v2655_v45 = vpop.permute.xlu1 %354  ;;  %v691_v7 = vsel %vm677_vm0, %v649_v58, 0.0  ;;  %v678_v13 = vsel %vm677_vm0, %v645_v63, 0.0 }
  0xc8   : > { %v435_v22 = vpop.f32.mrf.mxu2  ;;  %v464_v27 = vpop.f32.mrf.mxu3 }
  0xc9   : > { %v436_v37 = vadd.f32 %v435_v22, %v2642_v26  ;;  %v465_v40 = vadd.f32 %v464_v27, %v2642_v26 }
  0xca   : > { %v2062_v44 = vpop.eup %2061  ;;  %v2657_v46 = vpop.permute.xlu2 %632 }
  0xcb   : > { %v2064_v47 = vpop.eup %2063  ;;  %v646_v55 = vmul.f32 %v2062_v44, %v2657_v46  ;;  %v2663_v57 = vpop.permute.xlu0 %637 }
  0xcc   : > { %v380_v30 = vpop.f32.mrf.mxu0  ;;  %v650_v59 = vmul.f32 %v2064_v47, %v2657_v46 }
  0xcd   : > { %v409_v32 = vpop.f32.mrf.mxu1  ;;  %v381_v33 = vadd.f32 %v380_v30, %v2638_v23  ;;  %v679_v4 = vsel %vm677_vm0, %v646_v55, 0.0 }
  0xce   : > { %v410_v34 = vadd.f32 %v409_v32, %v2638_v23  ;;  %v692_v8 = vsel %vm677_vm0, %v650_v59, 0.0  ;;  %v680_v17 = vadd.f32 %v679_v4, %v678_v13 }
  0xcf   : > { %2065 = vtanh.f32 %v381_v33  ;;  %v693_v22 = vadd.f32 %v692_v8, %v691_v7 }
  0xd0   : > { %2067 = vtanh.f32 %v410_v34  ;;  %v2676_v15 = vpop.permute.xlu1 %642 }
  0xd1   : > { %2069 = vtanh.f32 %v433_v35 }
  0xd2   : > { %2071 = vtanh.f32 %v462_v36 }
  0xd3   : > { %v438_v38 = vpop.f32.mrf.mxu2  ;;  %2073 = vtanh.f32 %v436_v37 }
  0xd4   : > { %v439_v42 = vadd.f32 %v438_v38, %v2638_v23  ;;  %v467_v43 = vpop.f32.mrf.mxu3  ;;  %2075 = vtanh.f32 %v465_v40 }
  0xd5   : > { %v2066_v49 = vpop.eup %2065  ;;  %v468_v50 = vadd.f32 %v467_v43, %v2638_v23 }
  0xd6   : > { %v2068_v53 = vpop.eup %2067  ;;  %2077 = vtanh.f32 %v439_v42  ;;  %v647_v62 = vmul.f32 %v2066_v49, %v2663_v57 }
  0xd7   : > { %v383_v48 = vpop.f32.mrf.mxu0  ;;  %v2070_v61 = vpop.eup %2069  ;;  %v651_v2 = vmul.f32 %v2068_v53, %v2663_v57 }
  0xd8   : > { %v384_v51 = vadd.f32 %v383_v48, %v2655_v45  ;;  %v412_v52 = vpop.f32.mrf.mxu1  ;;  %v2072_v1 = vpop.eup %2071  ;;  %v681_v10 = vsel %vm677_vm0, %v647_v62, 0.0  ;;  %v653_v24 = vmul.f32 %v2070_v61, %v2645_v29 }
  0xd9   : > { %v413_v54 = vadd.f32 %v412_v52, %v2655_v45  ;;  %v2074_v3 = vpop.eup %2073  ;;  %v694_v0 = vsel %vm677_vm0, %v651_v2, 0.0  ;;  %v682_v32 = vadd.f32 %v681_v10, %v680_v17  ;;  %v657_v39 = vmul.f32 %v2072_v1, %v2645_v29 }
  0xda   : > { %2079 = vtanh.f32 %v384_v51  ;;  %v2076_v5 = vpop.eup %2075  ;;  %v654_v19 = vmul.f32 %v2074_v3, %v2657_v46  ;;  %v695_v33 = vadd.f32 %v694_v0, %v693_v22  ;;  %v704_v44 = vsel %vm677_vm0, %v653_v24, 0.0 }
  0xdb   : > { %2081 = vtanh.f32 %v413_v54  ;;  %v658_v35 = vmul.f32 %v2076_v5, %v2657_v46  ;;  %v717_v54 = vsel %vm677_vm0, %v657_v39, 0.0 }
  0xdc   : > { %2083 = vtanh.f32 %v468_v50  ;;  %v2078_v9 = vpop.eup %2077  ;;  %v705_v38 = vsel %vm677_vm0, %v654_v19, 0.0 }
  0xdd   : > { %v655_v27 = vmul.f32 %v2078_v9, %v2663_v57  ;;  %v706_v49 = vadd.f32 %v705_v38, %v704_v44  ;;  %v718_v50 = vsel %vm677_vm0, %v658_v35, 0.0 }
  0xde   : > { %v441_v6 = vpop.f32.mrf.mxu2  ;;  %v719_v5 = vadd.f32 %v718_v50, %v717_v54 }
  0xdf   : > { %v442_v11 = vadd.f32 %v441_v6, %v2655_v45  ;;  %v470_v12 = vpop.f32.mrf.mxu3  ;;  %v707_v42 = vsel %vm677_vm0, %v655_v27, 0.0 }
  0xe0   : > { %v2080_v14 = vpop.eup %2079  ;;  %v471_v16 = vadd.f32 %v470_v12, %v2655_v45  ;;  %v708_v63 = vadd.f32 %v707_v42, %v706_v49 }
  0xe1   : > { %v2082_v20 = vpop.eup %2081  ;;  %v648_v21 = vmul.f32 %v2080_v14, %v2676_v15  ;;  %2085 = vtanh.f32 %v442_v11 }
  0xe2   : > { %v2084_v25 = vpop.eup %2083  ;;  %v652_v28 = vmul.f32 %v2082_v20, %v2676_v15  ;;  %2087 = vtanh.f32 %v471_v16  ;;  %v490_v30 = vpop.f32.mrf.mxu0 }
  0xe3   : > { %v519_v31 = vpop.f32.mrf.mxu1  ;;  %v683_v34 = vsel %vm677_vm0, %v648_v21, 0.0  ;;  %v659_v40 = vmul.f32 %v2084_v25, %v2663_v57  ;;  %v491_v13 = vadd.f32 %v490_v30, %v2636_v18 }
  0xe4   : > { %v696_v36 = vsel %vm677_vm0, %v652_v28, 0.0  ;;  %v684_v37 = vadd.f32 %v683_v34, %v682_v32  ;;  %v520_v16 = vadd.f32 %v519_v31, %v2636_v18 }
  0xe5   : > { %v697_v41 = vadd.f32 %v696_v36, %v695_v33  ;;  %v720_v55 = vsel %vm677_vm0, %v659_v40, 0.0  ;;  %2089 = vtanh.f32 %v491_v13 }
  0xe6   : > { %v685_v43 = vrot.slane %v684_v37, 4  ;;  %v721_v9 = vadd.f32 %v720_v55, %v719_v5  ;;  %2091 = vtanh.f32 %v520_v16 }
  0xe7   : > { %v2086_v47 = vpop.eup %2085  ;;  %v698_v48 = vrot.slane %v697_v41, 4 }
  0xe8   : > { %v2088_v51 = vpop.eup %2087  ;;  %v656_v52 = vmul.f32 %v2086_v47, %v2676_v15  ;;  %v686_v53 = vadd.f32 %v685_v43, %v684_v37 }
  0xe9   : > { %v660_v58 = vmul.f32 %v2088_v51, %v2676_v15  ;;  %v548_v59 = vpop.f32.mrf.mxu2  ;;  %v577_v61 = vpop.f32.mrf.mxu3  ;;  %v699_v62 = vadd.f32 %v698_v48, %v697_v41 }
  0xea   : > { %v493_v1 = vpop.f32.mrf.mxu0  ;;  %v687_v3 = vrot.slane %v686_v53, 2  ;;  %v709_v4 = vsel %vm677_vm0, %v656_v52, 0.0  ;;  %v549_v38 = vadd.f32 %v548_v59, %v2636_v18  ;;  %v578_v41 = vadd.f32 %v577_v61, %v2636_v18 }
  0xeb   : > { %v522_v2 = vpop.f32.mrf.mxu1  ;;  %v700_v6 = vrot.slane %v699_v62, 2  ;;  %v710_v7 = vadd.f32 %v709_v4, %v708_v63  ;;  %v722_v10 = vsel %vm677_vm0, %v660_v58, 0.0  ;;  %v494_v20 = vadd.f32 %v493_v1, %v2642_v26  ;;  %v2090_v48 = vpop.eup %2089 }
  0xec   : > { %v688_v8 = vadd.f32 %v687_v3, %v686_v53  ;;  %v723_v0 = vadd.f32 %v722_v10, %v721_v9  ;;  %v523_v24 = vadd.f32 %v522_v2, %v2642_v26  ;;  %v2092_v50 = vpop.eup %2091 }
  0xed   : > { %v701_v11 = vadd.f32 %v700_v6, %v699_v62  ;;  %v711_v12 = vrot.slane %v710_v7, 4  ;;  %2093 = vtanh.f32 %v494_v20  ;;  %v661_v6 = vmul.f32 %v2090_v48, %v2645_v29 }
  0xee   : > { %v689_v14 = vrot.slane %v688_v8, 1  ;;  %v724_v22 = vrot.slane %v723_v0, 4  ;;  %2095 = vtanh.f32 %v523_v24  ;;  %v665_v9 = vmul.f32 %v2092_v50, %v2645_v29 }
  0xef   : > { %v702_v17 = vrot.slane %v701_v11, 1  ;;  %v712_v19 = vadd.f32 %v711_v12, %v710_v7 }
  0xf0   : > { %v2703_v21 = vadd.f32 %v689_v14, %v688_v8  ;;  %v725_v34 = vadd.f32 %v724_v22, %v723_v0 }
  0xf1   : > { %v551_v25 = vpop.f32.mrf.mxu2  ;;  %v580_v27 = vpop.f32.mrf.mxu3  ;;  %v2706_v28 = vadd.f32 %v702_v17, %v701_v11  ;;  %v713_v32 = vrot.slane %v712_v19, 2 }
  0xf2   : > { %v496_v30 = vpop.f32.mrf.mxu0  ;;  %v782_v31 = vsel %vm677_vm0, %v2703_v21, -inf  ;;  %v726_v40 = vrot.slane %v725_v34, 2  ;;  %v552_v42 = vadd.f32 %v551_v25, %v2642_v26  ;;  %v581_v44 = vadd.f32 %v580_v27, %v2642_v26 }
  0xf3   : > { %v525_v33 = vpop.f32.mrf.mxu1  ;;  %v497_v35 = vadd.f32 %v496_v30, %v2638_v23  ;;  %v785_v37 = vsel %vm677_vm0, %v2706_v28, -inf  ;;  %783 = vmax.xlane.f32.xlu2 %v782_v31  ;;  %v714_v39 = vadd.f32 %v713_v32, %v712_v19  ;;  %v2094_v54 = vpop.eup %2093  ;;  %v730_v19 = vsel %vm677_vm0, %v661_v6, 0.0 }
  0xf4   : > { %v526_v36 = vadd.f32 %v525_v33, %v2638_v23  ;;  %786 = vmax.xlane.f32.xlu0 %v785_v37  ;;  %v727_v47 = vadd.f32 %v726_v40, %v725_v34  ;;  %v2096_v61 = vpop.eup %2095  ;;  %v662_v4 = vmul.f32 %v2094_v54, %v2657_v46  ;;  %v743_v27 = vsel %vm677_vm0, %v665_v9, 0.0 }
  0xf5   : > { %2097 = vtanh.f32 %v497_v35  ;;  %v715_v43 = vrot.slane %v714_v39, 1  ;;  %v666_v7 = vmul.f32 %v2096_v61, %v2657_v46 }
  0xf6   : > { %2099 = vtanh.f32 %v526_v36  ;;  %v728_v53 = vrot.slane %v727_v47, 1  ;;  %v731_v14 = vsel %vm677_vm0, %v662_v4, 0.0 }
  0xf7   : > { %2101 = vtanh.f32 %v549_v38  ;;  %v2718_v49 = vadd.f32 %v715_v43, %v714_v39  ;;  %v744_v20 = vsel %vm677_vm0, %v666_v7, 0.0  ;;  %v732_v34 = vadd.f32 %v731_v14, %v730_v19 }
  0xf8   : > { %2103 = vtanh.f32 %v578_v41  ;;  %v2726_v1 = vadd.f32 %v728_v53, %v727_v47  ;;  %v745_v38 = vadd.f32 %v744_v20, %v743_v27 }
  0xf9   : > { %v554_v51 = vpop.f32.mrf.mxu2  ;;  %v583_v52 = vpop.f32.mrf.mxu3  ;;  %2105 = vtanh.f32 %v552_v42  ;;  %v788_v26 = vsel %vm677_vm0, %v2718_v49, -inf }
  0xfa   : > { %v555_v18 = vadd.f32 %v554_v51, %v2638_v23  ;;  %v584_v55 = vadd.f32 %v583_v52, %v2638_v23  ;;  %v499_v58 = vpop.f32.mrf.mxu0  ;;  %2107 = vtanh.f32 %v581_v44  ;;  %789 = vmax.xlane.f32.xlu1 %v788_v26  ;;  %v791_v23 = vsel %vm677_vm0, %v2726_v1, -inf }
  0xfb   : > { %v528_v59 = vpop.f32.mrf.mxu1  ;;  %v500_v62 = vadd.f32 %v499_v58, %v2655_v45  ;;  %v2098_v2 = vpop.eup %2097  ;;  %792 = vmax.xlane.f32.xlu2 %v791_v23 }
  0xfc   : > { %v529_v63 = vadd.f32 %v528_v59, %v2655_v45  ;;  %2109 = vtanh.f32 %v555_v18  ;;  %v2100_v3 = vpop.eup %2099  ;;  %v663_v10 = vmul.f32 %v2098_v2, %v2663_v57 }
  0xfd   : > { %2111 = vtanh.f32 %v584_v55  ;;  %v2102_v5 = vpop.eup %2101  ;;  %v667_v12 = vmul.f32 %v2100_v3, %v2663_v57 }
  0xfe   : > { %2113 = vtanh.f32 %v500_v62  ;;  %v2104_v8 = vpop.eup %2103  ;;  %v669_v32 = vmul.f32 %v2102_v5, %v2645_v29  ;;  %v733_v33 = vsel %vm677_vm0, %v663_v10, 0.0 }
  0xff   : > { %2115 = vtanh.f32 %v529_v63  ;;  %v2106_v11 = vpop.eup %2105  ;;  %v746_v36 = vsel %vm677_vm0, %v667_v12, 0.0  ;;  %v673_v40 = vmul.f32 %v2104_v8, %v2645_v29  ;;  %v734_v43 = vadd.f32 %v733_v33, %v732_v34 }
 0x100   : > { %v2108_v13 = vpop.eup %2107  ;;  %v670_v30 = vmul.f32 %v2106_v11, %v2657_v46  ;;  %v756_v52 = vsel %vm677_vm0, %v669_v32, 0.0 }
 0x101   : > { %v557_v0 = vpop.f32.mrf.mxu2  ;;  %v586_v16 = vpop.f32.mrf.mxu3  ;;  %v674_v35 = vmul.f32 %v2108_v13, %v2657_v46  ;;  %v747_v46 = vadd.f32 %v746_v36, %v745_v38 }
 0x102   : > { %v2110_v17 = vpop.eup %2109  ;;  %v558_v22 = vadd.f32 %v557_v0, %v2655_v45  ;;  %v587_v24 = vadd.f32 %v586_v16, %v2655_v45  ;;  %v757_v44 = vsel %vm677_vm0, %v670_v30, 0.0 }
 0x103   : > { %v2112_v25 = vpop.eup %2111  ;;  %v671_v45 = vmul.f32 %v2110_v17, %v2663_v57  ;;  %v770_v48 = vsel %vm677_vm0, %v674_v35, 0.0  ;;  %v758_v18 = vadd.f32 %v757_v44, %v756_v52  ;;  %v2154_v52 = vld [vmem:[%s2421_s6 + $0x18] sm:$0xff] }
 0x104   : > { %v2114_v31 = vpop.eup %2113  ;;  %2117 = vtanh.f32 %v558_v22  ;;  %v675_v41 = vmul.f32 %v2112_v25, %v2663_v57  ;;  %v769_v57 = vsel %vm677_vm0, %v673_v40, 0.0 }
 0x105   : > { %v2116_v37 = vpop.eup %2115  ;;  %v664_v39 = vmul.f32 %v2114_v31, %v2676_v15  ;;  %2119 = vtanh.f32 %v587_v24  ;;  %v759_v53 = vsel %vm677_vm0, %v671_v45, 0.0  ;;  %v771_v26 = vadd.f32 %v770_v48, %v769_v57  ;;  %v2155_v57 = vld [vmem:[%s2421_s6 + $0x20] sm:$0xff] }
 0x106   : > { %v668_v42 = vmul.f32 %v2116_v37, %v2676_v15  ;;  %v772_v55 = vsel %vm677_vm0, %v675_v41, 0.0  ;;  %v760_v3 = vadd.f32 %v759_v53, %v758_v18 }
 0x107   : > { %v735_v47 = vsel %vm677_vm0, %v664_v39, 0.0  ;;  %v773_v5 = vadd.f32 %v772_v55, %v771_v26  ;;  %v2156_v55 = vld [vmem:[%s2421_s6 + $0x28] sm:$0xff] }
 0x108   : > { %v748_v50 = vsel %vm677_vm0, %v668_v42, 0.0  ;;  %v736_v51 = vadd.f32 %v735_v47, %v734_v43 }
 0x109   : > { %v749_v29 = vadd.f32 %v748_v50, %v747_v46  ;;  %v2153_v50 = vld [vmem:[%s2421_s6 + $0x10] sm:$0xff] }
 0x10a   : > { %v2118_v54 = vpop.eup %2117  ;;  %v737_v58 = vrot.slane %v736_v51, 4 }
 0x10b   : > { %v2120_v59 = vpop.eup %2119  ;;  %v672_v61 = vmul.f32 %v2118_v54, %v2676_v15  ;;  %v750_v62 = vrot.slane %v749_v29, 4 }
 0x10c   : > { %v676_v63 = vmul.f32 %v2120_v59, %v2676_v15  ;;  %v738_v2 = vadd.f32 %v737_v58, %v736_v51  ;;  %v2157_v58 = vld [vmem:[%s2421_s6 + $0x30] sm:$0xff] }
 0x10d   : > { %v751_v4 = vadd.f32 %v750_v62, %v749_v29  ;;  %v761_v23 = vsel %vm677_vm0, %v672_v61, 0.0 }
 0x10e   : > { %v739_v6 = vrot.slane %v738_v2, 2  ;;  %v762_v7 = vadd.f32 %v761_v23, %v760_v3  ;;  %v774_v8 = vsel %vm677_vm0, %v676_v63, 0.0  ;;  %v2158_v63 = vld [vmem:[%s2421_s6 + $0x38] sm:$0xff]  ;;  %v2159_v3 = vld [vmem:[%s2421_s6 + $0x40] sm:$0xff]  ;;  %v2160_v23 = vld [vmem:[%s2421_s6 + $0x48] sm:$0xff] }
 0x10f   : > { %v752_v9 = vrot.slane %v751_v4, 2  ;;  %v775_v10 = vadd.f32 %v774_v8, %v773_v5 }
 0x110   : > { %v740_v11 = vadd.f32 %v739_v6, %v738_v2  ;;  %v763_v12 = vrot.slane %v762_v7, 4 }
 0x111   : > { %v753_v13 = vadd.f32 %v752_v9, %v751_v4  ;;  %v776_v14 = vrot.slane %v775_v10, 4  ;;  %v2161_v9 = vld [vmem:[%s2421_s6 + $0x50] sm:$0xff] }
 0x112   : > { %v741_v0 = vrot.slane %v740_v11, 1  ;;  %v764_v16 = vadd.f32 %v763_v12, %v762_v7 }
 0x113   : > { %v754_v17 = vrot.slane %v753_v13, 1  ;;  %v777_v15 = vadd.f32 %v776_v14, %v775_v10 }
 0x114   : > { %v2764_v19 = vadd.f32 %v741_v0, %v740_v11  ;;  %v765_v20 = vrot.slane %v764_v16, 2  ;;  %v2162_v11 = vld [vmem:[%s2421_s6 + $0x58] sm:$0xff] }
 0x115   : > { %v2766_v22 = vadd.f32 %v754_v17, %v753_v13  ;;  %v778_v24 = vrot.slane %v777_v15, 2  ;;  %v2163_v13 = vld [vmem:[%s2421_s6 + $0x60] sm:$0xff] }
 0x116   : > { %v794_v25 = vsel %vm677_vm0, %v2764_v19, -inf  ;;  %v766_v27 = vadd.f32 %v765_v20, %v764_v16 }
 0x117   : > { %v797_v32 = vsel %vm677_vm0, %v2766_v22, -inf  ;;  %795 = vmax.xlane.f32.xlu2 %v794_v25  ;;  %v779_v30 = vadd.f32 %v778_v24, %v777_v15  ;;  %v2164_v15 = vld [vmem:[%s2421_s6 + $0x68] sm:$0xff]  ;;  %v2165_v24 = vld [vmem:[%s2421_s6 + $0x70] sm:$0xff] }
 0x118   : > { %798 = vmax.xlane.f32.xlu0 %v797_v32  ;;  %v767_v33 = vrot.slane %v766_v27, 1 }
 0x119   : > { %v780_v31 = vrot.slane %v779_v30, 1 }
 0x11a   : > { %v2772_v34 = vadd.f32 %v767_v33, %v766_v27  ;;  %v2166_v27 = vld [vmem:[%s2421_s6 + $0x78] sm:$0xff] }
 0x11b   : > { %v2774_v35 = vadd.f32 %v780_v31, %v779_v30 }
 0x11c   : > { %v800_v36 = vsel %vm677_vm0, %v2772_v34, -inf }
 0x11d   : > { %801 = vmax.xlane.f32.xlu1 %v800_v36  ;;  %v803_v37 = vsel %vm677_vm0, %v2774_v35, -inf  ;;  %v2167_v36 = vld [vmem:[%s2421_s6 + $0x80] sm:$0xff] }
 0x11f   : > { %804 = vmax.xlane.f32.xlu2 %v803_v37 }
 0x166   : > { %v784_v38 = vpop.xlane.xlu2 %783 }
 0x167   : > { %v787_v45 = vpop.xlane.xlu0 %786  ;;  %v806_v39 = vsub.f32 %v2703_v21, %v784_v38  ;;  %v2168_v38 = vld [vmem:[%s2421_s6 + $0x88] sm:$0xff] }
 0x168   : > { %v807_v40 = vsub.f32 %v2706_v28, %v787_v45 }
 0x169   : > { %v814_v41 = vmul.f32 1.442695, %v806_v39  ;;  %v2169_v39 = vld [vmem:[%s2421_s6 + $0x90] sm:$0xff] }
 0x16a   : > { %v816_v42 = vmul.f32 1.442695, %v807_v40 }
 0x16b   : > { %2121 = vpow2.f32 %v814_v41 }
 0x16c   : > { %2123 = vpow2.f32 %v816_v42 }
 0x171   : > { %v2122_v43 = vpop.eup %2121 }
 0x172   : > { %v2782_v44 = vpop.eup %2123  ;;  %v830_v46 = vsel %vm677_vm0, %v2122_v43, 0.0  ;;  %v854_v47 = vmul.f32 %v2122_v43, %v2486_v60  ;;  %v855_v28 = vmul.f32 %v2122_v43, %v2480_v56  ;;  %v856_v51 = vmul.f32 %v2153_v50, %v2122_v43 }
 0x173   : > { %v833_v48 = vsel %vm677_vm0, %v2782_v44, 0.0  ;;  %831 = vadd.xlane.f32.xlu0 %v830_v46  ;;  %v857_v53 = vmul.f32 %v2154_v52, %v2122_v43  ;;  %v858_v18 = vmul.f32 %v2155_v57, %v2122_v43  ;;  %v859_v56 = vmul.f32 %v2156_v55, %v2122_v43  ;;  %v2170_v46 = vld [vmem:[%s2421_s6 + $0x98] sm:$0xff] }
 0x174   : > { %834 = vadd.xlane.f32.xlu1 %v833_v48  ;;  %v982_v21 = vsel %vm677_vm0, %v854_v47, 0.0  ;;  %v985_v29 = vsel %vm677_vm0, %v855_v28, 0.0  ;;  %v988_v60 = vsel %vm677_vm0, %v856_v51, 0.0  ;;  %v860_v59 = vmul.f32 %v2157_v58, %v2122_v43  ;;  %v2171_v48 = vld [vmem:[%s2421_s6 + $0xa0] sm:$0xff]  ;;  %v2172_v28 = vld [vmem:[%s2421_s6 + $0xa8] sm:$0xff]  ;;  %v790_v58 = vpop.xlane.xlu1 %789 }
 0x175   : > { %983 = vadd.xlane.f32.xlu2 %v982_v21  ;;  %v991_v54 = vsel %vm677_vm0, %v857_v53, 0.0  ;;  %v994_v26 = vsel %vm677_vm0, %v858_v18, 0.0  ;;  %v997_v61 = vsel %vm677_vm0, %v859_v56, 0.0  ;;  %v861_v2 = vmul.f32 %v2158_v63, %v2122_v43  ;;  %v2175_v18 = vld [vmem:[%s2421_s6 + $0xc0] sm:$0xff] }
 0x176   : > { %v1000_v62 = vsel %vm677_vm0, %v860_v59, 0.0  ;;  %v862_v4 = vmul.f32 %v2159_v3, %v2122_v43  ;;  %v863_v5 = vmul.f32 %v2160_v23, %v2122_v43  ;;  %v864_v10 = vmul.f32 %v2161_v9, %v2122_v43  ;;  %v2179_v9 = vld [vmem:[%s2421_s6 + $0xe0] sm:$0xff] }
 0x177   : > { %v1003_v6 = vsel %vm677_vm0, %v861_v2, 0.0  ;;  %v865_v12 = vmul.f32 %v2162_v11, %v2122_v43  ;;  %v866_v14 = vmul.f32 %v2163_v13, %v2122_v43  ;;  %v867_v20 = vmul.f32 %v2164_v15, %v2122_v43  ;;  %v2177_v2 = vld [vmem:[%s2421_s6 + $0xd0] sm:$0xff]  ;;  %v2180_v11 = vld [vmem:[%s2421_s6 + $0xe8] sm:$0xff] }
 0x178   : > { %v1006_v7 = vsel %vm677_vm0, %v862_v4, 0.0  ;;  %v1009_v8 = vsel %vm677_vm0, %v863_v5, 0.0  ;;  %v1012_v0 = vsel %vm677_vm0, %v864_v10, 0.0  ;;  %v868_v25 = vmul.f32 %v2165_v24, %v2122_v43  ;;  %v2178_v4 = vld [vmem:[%s2421_s6 + $0xd8] sm:$0xff]  ;;  %v2181_v13 = vld [vmem:[%s2421_s6 + $0xf0] sm:$0xff] }
 0x179   : > { %v1015_v16 = vsel %vm677_vm0, %v865_v12, 0.0  ;;  %v1018_v17 = vsel %vm677_vm0, %v866_v14, 0.0  ;;  %v869_v32 = vmul.f32 %v2166_v27, %v2122_v43  ;;  %v1021_v30 = vsel %vm677_vm0, %v867_v20, 0.0 }
 0x17a   : > { %v1024_v33 = vsel %vm677_vm0, %v868_v25, 0.0  ;;  %v870_v37 = vmul.f32 %v2167_v36, %v2782_v44  ;;  %v871_v45 = vmul.f32 %v2168_v38, %v2782_v44  ;;  %v872_v40 = vmul.f32 %v2169_v39, %v2782_v44  ;;  %v2182_v25 = vld [vmem:[%s2421_s6 + $0xf8] sm:$0xff]  ;;  %v2185_v38 = vld [vmem:[%s2421_s6 + $0x108] sm:$0xff] }
 0x17b   : > { %986 = vadd.xlane.f32.xlu0 %v985_v29  ;;  %v1027_v31 = vsel %vm677_vm0, %v869_v32, 0.0  ;;  %v873_v47 = vmul.f32 %v2170_v46, %v2782_v44  ;;  %v874_v21 = vmul.f32 %v2171_v48, %v2782_v44  ;;  %v875_v50 = vmul.f32 %v2172_v28, %v2782_v44  ;;  %v2173_v29 = vld [vmem:[%s2421_s6 + $0xb0] sm:$0xff]  ;;  %v2183_v32 = vld [vmem:[%s2421_s6 + $0x100] sm:$0xff] }
 0x17c   : > { %989 = vadd.xlane.f32.xlu1 %v988_v60  ;;  %v1030_v41 = vsel %vm677_vm0, %v870_v37, 0.0  ;;  %v1033_v42 = vsel %vm677_vm0, %v871_v45, 0.0  ;;  %v1036_v43 = vsel %vm677_vm0, %v872_v40, 0.0  ;;  %v876_v60 = vmul.f32 %v2173_v29, %v2782_v44  ;;  %v2189_v29 = vld [vmem:[%s2421_s6 + $0x128] sm:$0xff] }
 0x17d   : > { %992 = vadd.xlane.f32.xlu2 %v991_v54  ;;  %v1039_v51 = vsel %vm677_vm0, %v873_v47, 0.0  ;;  %v1042_v52 = vsel %vm677_vm0, %v874_v21, 0.0  ;;  %v1045_v53 = vsel %vm677_vm0, %v875_v50, 0.0  ;;  %v2174_v54 = vld [vmem:[%s2421_s6 + $0xb8] sm:$0xff]  ;;  %v878_v55 = vmul.f32 %v2175_v18, %v2782_v44  ;;  %v2187_v47 = vld [vmem:[%s2421_s6 + $0x130] sm:$0xff]  ;;  %v2188_v21 = vld [vmem:[%s2421_s6 + $0x120] sm:$0xff] }
 0x17e   : > { %v877_v57 = vmul.f32 %v2174_v54, %v2782_v44  ;;  %v1048_v56 = vsel %vm677_vm0, %v876_v60, 0.0  ;;  %v880_v3 = vmul.f32 %v2177_v2, %v2782_v44  ;;  %v881_v23 = vmul.f32 %v2178_v4, %v2782_v44  ;;  %v2192_v2 = vld [vmem:[%s2421_s6 + $0x140] sm:$0xff] }
 0x17f   : > { %v882_v10 = vmul.f32 %v2179_v9, %v2782_v44  ;;  %v883_v12 = vmul.f32 %v2180_v11, %v2782_v44  ;;  %v884_v14 = vmul.f32 %v2181_v13, %v2782_v44  ;;  %v885_v27 = vmul.f32 %v2182_v25, %v2782_v44 }
 0x180   : > { %v1051_v59 = vsel %vm677_vm0, %v877_v57, 0.0  ;;  %v2190_v57 = vld [vmem:[%s2421_s6 + $0x148] sm:$0xff] }
 0x181   : > { %v1072_v20 = vsel %vm677_vm0, %v884_v14, 0.0 }
 0x183   : > { %995 = vadd.xlane.f32.xlu0 %v994_v26  ;;  %v1054_v26 = vsel %vm677_vm0, %v878_v55, 0.0 }
 0x184   : > { %998 = vadd.xlane.f32.xlu1 %v997_v61  ;;  %v808_v61 = vsub.f32 %v2718_v49, %v790_v58  ;;  %v1063_v49 = vsel %vm677_vm0, %v881_v23, 0.0  ;;  %v2193_v23 = vld [vmem:[%s2421_s6 + $0x160] sm:$0xff] }
 0x185   : > { %1001 = vadd.xlane.f32.xlu2 %v1000_v62  ;;  %v2176_v62 = vld [vmem:[%s2421_s6 + $0xc8] sm:$0xff] }
 0x186   : > { %v879_v63 = vmul.f32 %v2176_v62, %v2782_v44  ;;  %v818_v5 = vmul.f32 1.442695, %v808_v61  ;;  %v2184_v44 = vld [vmem:[%s2421_s6 + $0x118] sm:$0xff]  ;;  %v1630_v62 = vlaneseq }
 0x188   : > { %2125 = vpow2.f32 %v818_v5 }
 0x18b   : > { %1004 = vadd.xlane.f32.xlu0 %v1003_v6  ;;  %v1057_v6 = vsel %vm677_vm0, %v879_v63, 0.0 }
 0x18c   : > { %1007 = vadd.xlane.f32.xlu1 %v1006_v7  ;;  %v1060_v7 = vsel %vm677_vm0, %v880_v3, 0.0 }
 0x18d   : > { %1010 = vadd.xlane.f32.xlu2 %v1009_v8  ;;  %v793_v8 = vpop.xlane.xlu2 %792 }
 0x18e   : > { %v2865_v15 = vpop.eup %2125 }
 0x18f   : > { %v889_v37 = vmul.f32 %v2184_v44, %v2865_v15  ;;  %v887_v45 = vmul.f32 %v2185_v38, %v2865_v15  ;;  %v892_v48 = vmul.f32 %v2187_v47, %v2865_v15  ;;  %v890_v28 = vmul.f32 %v2188_v21, %v2865_v15  ;;  %v2197_v44 = vld [vmem:[%s2421_s6 + $0x168] sm:$0xff] }
 0x190   : > { %v891_v60 = vmul.f32 %v2189_v29, %v2865_v15  ;;  %v2901_v54 = vpop.xlane.xlu1 %801  ;;  %v895_v18 = vmul.f32 %v2190_v57, %v2865_v15  ;;  %v894_v3 = vmul.f32 %v2192_v2, %v2865_v15  ;;  %v898_v5 = vmul.f32 %v2193_v23, %v2865_v15 }
 0x191   : > { %v1087_v40 = vsel %vm677_vm0, %v889_v37, 0.0  ;;  %v899_v37 = vmul.f32 %v2197_v44, %v2865_v15 }
 0x192   : > { %v1102_v9 = vsel %vm677_vm0, %v894_v3, 0.0 }
 0x193   : > { %1013 = vadd.xlane.f32.xlu0 %v1012_v0  ;;  %v809_v0 = vsub.f32 %v2726_v1, %v793_v8  ;;  %v886_v1 = vmul.f32 %v2183_v32, %v2865_v15  ;;  %v2920_v8 = vand.u32 127, %v1630_v62  ;;  %v2196_v32 = vld [vmem:[%s2421_s6 + $0x178] sm:$0xff] }
 0x194   : > { %1016 = vadd.xlane.f32.xlu1 %v1015_v16  ;;  %v1066_v16 = vsel %vm677_vm0, %v882_v10, 0.0  ;;  %v1114_v10 = vsel %vm677_vm0, %v898_v5, 0.0 }
 0x195   : > { %1019 = vadd.xlane.f32.xlu2 %v1018_v17  ;;  %v1069_v17 = vsel %vm677_vm0, %v883_v12, 0.0  ;;  %v820_v24 = vmul.f32 1.442695, %v809_v0  ;;  %v2928_v13 = vadd.s32 4294967288, %v2920_v8  ;;  %v2932_v0 = vadd.s32 4294967280, %v2920_v8 }
 0x197   : > { %2127 = vpow2.f32 %v820_v24 }
 0x19b   : > { %1022 = vadd.xlane.f32.xlu0 %v1021_v30  ;;  %v1075_v30 = vsel %vm677_vm0, %v885_v27, 0.0  ;;  %v2938_v27 = vadd.s32 4294967272, %v2920_v8 }
 0x19c   : > { %1025 = vadd.xlane.f32.xlu1 %v1024_v33  ;;  %v1078_v33 = vsel %vm677_vm0, %v886_v1, 0.0  ;;  %v901_v1 = vmul.f32 %v2196_v32, %v2865_v15  ;;  %v2202_v32 = vld [vmem:[%s2421_s6 + $0x1a8] sm:$0xff] }
 0x19d   : > { %1028 = vadd.xlane.f32.xlu2 %v1027_v31  ;;  %v836_v31 = vsel %vm677_vm0, %v2865_v15, 0.0  ;;  %v2876_v36 = vpop.eup %2127 }
 0x19e   : > { %v839_v39 = vsel %vm677_vm0, %v2876_v36, 0.0 }
 0x1a3   : > { %1031 = vadd.xlane.f32.xlu0 %v1030_v41  ;;  %v1081_v41 = vsel %vm677_vm0, %v887_v45, 0.0 }
 0x1a4   : > { %1034 = vadd.xlane.f32.xlu1 %v1033_v42  ;;  %v2886_v42 = vpop.xlane.xlu2 %795 }
 0x1a5   : > { %1037 = vadd.xlane.f32.xlu2 %v1036_v43  ;;  %v2186_v43 = vld [vmem:[%s2421_s6 + $0x110] sm:$0xff] }
 0x1a6   : > { %v888_v46 = vmul.f32 %v2186_v43, %v2865_v15 }
 0x1a8   : > { %v1084_v50 = vsel %vm677_vm0, %v888_v46, 0.0  ;;  %v1123_v46 = vsel %vm677_vm0, %v901_v1, 0.0  ;;  %v907_v1 = vmul.f32 %v2202_v32, %v2876_v36  ;;  %v2207_v32 = vld [vmem:[%s2421_s6 + $0x1b8] sm:$0xff] }
 0x1ab   : > { %1040 = vadd.xlane.f32.xlu0 %v1039_v51  ;;  %v1096_v51 = vsel %vm677_vm0, %v892_v48, 0.0  ;;  %v1117_v48 = vsel %vm677_vm0, %v899_v37, 0.0 }
 0x1ac   : > { %1043 = vadd.xlane.f32.xlu1 %v1042_v52  ;;  %v1090_v52 = vsel %vm677_vm0, %v890_v28, 0.0  ;;  %v2905_v55 = vpop.xlane.xlu2 %804  ;;  %v2957_v28 = vadd.s32 4294967264, %v2920_v8 }
 0x1ad   : > { %1046 = vadd.xlane.f32.xlu2 %v1045_v53  ;;  %v2897_v53 = vpop.xlane.xlu0 %798 }
 0x1b3   : > { %1049 = vadd.xlane.f32.xlu0 %v1048_v56  ;;  %v2191_v56 = vld [vmem:[%s2421_s6 + $0x138] sm:$0xff] }
 0x1b4   : > { %1052 = vadd.xlane.f32.xlu1 %v1051_v59  ;;  %v893_v58 = vmul.f32 %v2191_v56, %v2865_v15  ;;  %v1093_v59 = vsel %vm677_vm0, %v891_v60, 0.0  ;;  %v2199_v56 = vld [vmem:[%s2421_s6 + $0x190] sm:$0xff] }
 0x1b5   : > { %1055 = vadd.xlane.f32.xlu2 %v1054_v26  ;;  %v1105_v26 = vsel %vm677_vm0, %v895_v18, 0.0  ;;  %v2966_v18 = vadd.s32 4294967248, %v2920_v8 }
 0x1b6   : > { %v1099_v61 = vsel %vm677_vm0, %v893_v58, 0.0  ;;  %v904_v58 = vmul.f32 %v2199_v56, %v2876_v36 }
 0x1bb   : > { %1058 = vadd.xlane.f32.xlu0 %v1057_v6 }
 0x1bc   : > { %1061 = vadd.xlane.f32.xlu1 %v1060_v7  ;;  %v2194_v7 = vld [vmem:[%s2421_s6 + $0x150] sm:$0xff] }
 0x1bd   : > { %1064 = vadd.xlane.f32.xlu2 %v1063_v49  ;;  %v896_v49 = vmul.f32 %v2194_v7, %v2865_v15 }
 0x1bf   : > { %v1108_v11 = vsel %vm677_vm0, %v896_v49, 0.0 }
 0x1c3   : > { %1067 = vadd.xlane.f32.xlu0 %v1066_v16 }
 0x1c4   : > { %1070 = vadd.xlane.f32.xlu1 %v1069_v17  ;;  %v2195_v17 = vld [vmem:[%s2421_s6 + $0x158] sm:$0xff] }
 0x1c5   : > { %1073 = vadd.xlane.f32.xlu2 %v1072_v20  ;;  %v897_v20 = vmul.f32 %v2195_v17, %v2865_v15 }
 0x1cb   : > { %1076 = vadd.xlane.f32.xlu0 %v1075_v30 }
 0x1cc   : > { %1079 = vadd.xlane.f32.xlu1 %v1078_v33 }
 0x1cd   : > { %837 = vadd.xlane.f32.xlu2 %v836_v31 }
 0x1d3   : > { %840 = vadd.xlane.f32.xlu0 %v839_v39 }
 0x1d4   : > { %1088 = vadd.xlane.f32.xlu1 %v1087_v40  ;;  %v1111_v40 = vsel %vm677_vm0, %v897_v20, 0.0 }
 0x1d5   : > { %1082 = vadd.xlane.f32.xlu2 %v1081_v41 }
 0x1db   : > { %1085 = vadd.xlane.f32.xlu0 %v1084_v50  ;;  %v2960_v50 = vadd.s32 4294967256, %v2920_v8 }
 0x1dc   : > { %1097 = vadd.xlane.f32.xlu1 %v1096_v51 }
 0x1dd   : > { %1091 = vadd.xlane.f32.xlu2 %v1090_v52  ;;  %v2198_v52 = vld [vmem:[%s2421_s6 + $0x170] sm:$0xff] }
 0x1de   : > { %v900_v29 = vmul.f32 %v2198_v52, %v2865_v15 }
 0x1e0   : > { %v1120_v3 = vsel %vm677_vm0, %v900_v29, 0.0  ;;  %v2204_v29 = vld [vmem:[%s2421_s6 + $0x1a0] sm:$0xff] }
 0x1e3   : > { %1094 = vadd.xlane.f32.xlu0 %v1093_v59 }
 0x1e4   : > { %1106 = vadd.xlane.f32.xlu1 %v1105_v26 }
 0x1e5   : > { %1100 = vadd.xlane.f32.xlu2 %v1099_v61  ;;  %v2200_v61 = vld [vmem:[%s2421_s6 + $0x180] sm:$0xff] }
 0x1e6   : > { %v832_v63 = vpop.xlane.xlu0 %831  ;;  %v902_v62 = vmul.f32 %v2200_v61, %v2876_v36 }
 0x1e7   : > { %v2914_v4 = vpop.xlane.xlu1 %834  ;;  %2129 = vrcp.f32 %v832_v63 }
 0x1e8   : > { %v984_v6 = vpop.xlane.xlu2 %983  ;;  %v1126_v49 = vsel %vm677_vm0, %v902_v62, 0.0  ;;  %2131 = vrcp.f32 %v2914_v4 }
 0x1eb   : > { %1103 = vadd.xlane.f32.xlu0 %v1102_v9 }
 0x1ec   : > { %1115 = vadd.xlane.f32.xlu1 %v1114_v10  ;;  %v2984_v10 = vadd.s32 4294967240, %v2920_v8 }
 0x1ed   : > { %v2925_v12 = vpop.eup %2129  ;;  %1109 = vadd.xlane.f32.xlu2 %v1108_v11  ;;  %v2987_v11 = vadd.s32 4294967232, %v2920_v8 }
 0x1ee   : > { %v1374_v14 = vmul.f32 %v2925_v12, %v984_v6  ;;  %v987_v16 = vpop.xlane.xlu0 %986  ;;  %v1132_v6 = vsel %vm677_vm0, %v904_v58, 0.0  ;;  %v3020_v58 = vadd.s32 4294967200, %v2920_v8 }
 0x1ef   : > { %v990_v24 = vpop.xlane.xlu1 %989  ;;  %v1375_v25 = vmul.f32 %v2925_v12, %v987_v16  ;;  %v2201_v16 = vld [vmem:[%s2421_s6 + $0x188] sm:$0xff] }
 0x1f0   : > { %v1632_v30 = vperm.slane %v1374_v14, %v2920_v8  ;;  %v1376_v33 = vmul.f32 %v2925_v12, %v990_v24  ;;  %v993_v31 = vpop.xlane.xlu2 %992  ;;  %v903_v17 = vmul.f32 %v2201_v16, %v2876_v36 }
 0x1f1   : > { %v1634_v38 = vperm.slane %v1375_v25, %v2928_v13  ;;  %v1377_v45 = vmul.f32 %v2925_v12, %v993_v31  ;;  %v2993_v25 = vadd.s32 4294967224, %v2920_v8  ;;  %v2203_v31 = vld [vmem:[%s2421_s6 + $0x198] sm:$0xff] }
 0x1f2   : > { %v1638_v39 = vperm.slane %v1376_v33, %v2932_v0  ;;  %v905_v44 = vmul.f32 %v2203_v31, %v2876_v36  ;;  %v3047_v31 = vadd.s32 4294967176, %v2920_v8 }
 0x1f3   : > { %v1636_v41 = vsel %vm1635_vm1, %v1634_v38, %v1632_v30  ;;  %v1642_v43 = vperm.slane %v1377_v45, %v2938_v27  ;;  %1112 = vadd.xlane.f32.xlu0 %v1111_v40 }
 0x1f4   : > { %v1640_v47 = vsel %vm1639_vm2, %v1638_v39, %v1636_v41  ;;  %1124 = vadd.xlane.f32.xlu1 %v1123_v46  ;;  %v1129_v39 = vsel %vm677_vm0, %v903_v17, 0.0  ;;  %v3038_v17 = vadd.s32 4294967192, %v2920_v8 }
 0x1f5   : > { %v1644_v21 = vsel %vm1643_vm3, %v1642_v43, %v1640_v47  ;;  %1118 = vadd.xlane.f32.xlu2 %v1117_v48  ;;  %v1141_v43 = vsel %vm677_vm0, %v907_v1, 0.0  ;;  %v1135_v47 = vsel %vm677_vm0, %v905_v44, 0.0  ;;  %v909_v1 = vmul.f32 %v2207_v32, %v2876_v36  ;;  %v2208_v44 = vld [vmem:[%s2421_s6 + $0x1d8] sm:$0xff] }
 0x1f6   : > { %v996_v51 = vpop.xlane.xlu0 %995 }
 0x1f7   : > { %v999_v60 = vpop.xlane.xlu1 %998  ;;  %v1378_v57 = vmul.f32 %v2925_v12, %v996_v51  ;;  %v3014_v51 = vadd.s32 4294967208, %v2920_v8  ;;  %v1147_v4 = vsel %vm677_vm0, %v909_v1, 0.0 }
 0x1f8   : > { %v1379_v59 = vmul.f32 %v2925_v12, %v999_v60  ;;  %v1002_v26 = vpop.xlane.xlu2 %1001  ;;  %v906_v60 = vmul.f32 %v2204_v29, %v2876_v36 }
 0x1f9   : > { %v1646_v63 = vperm.slane %v1378_v57, %v2957_v28  ;;  %v1380_v15 = vmul.f32 %v2925_v12, %v1002_v26 }
 0x1fa   : > { %v1650_v2 = vperm.slane %v1379_v59, %v2960_v50  ;;  %v2205_v59 = vld [vmem:[%s2421_s6 + $0x1c0] sm:$0xff] }
 0x1fb   : > { %v1648_v23 = vsel %vm1647_vm4, %v1646_v63, %v1644_v21  ;;  %v1654_v5 = vperm.slane %v1380_v15, %v2966_v18  ;;  %1121 = vadd.xlane.f32.xlu0 %v1120_v3  ;;  %v3011_v21 = vadd.s32 4294967216, %v2920_v8  ;;  %v910_v26 = vmul.f32 %v2205_v59, %v2876_v36  ;;  %v2206_v63 = vld [vmem:[%s2421_s6 + $0x1b0] sm:$0xff] }
 0x1fc   : > { %v1652_v7 = vsel %vm1651_vm5, %v1650_v2, %v1648_v23  ;;  %1133 = vadd.xlane.f32.xlu1 %v1132_v6  ;;  %v908_v15 = vmul.f32 %v2206_v63, %v2876_v36  ;;  %v2210_v59 = vld [vmem:[%s2421_s6 + $0x1d0] sm:$0xff] }
 0x1fd   : > { %v1656_v9 = vsel %vm1655_vm6, %v1654_v5, %v1652_v7  ;;  %1127 = vadd.xlane.f32.xlu2 %v1126_v49  ;;  %v1138_v5 = vsel %vm677_vm0, %v906_v60, 0.0  ;;  %v1150_v49 = vsel %vm677_vm0, %v910_v26, 0.0  ;;  %v912_v26 = vmul.f32 %v2210_v59, %v2876_v36  ;;  %v2211_v63 = vld [vmem:[%s2421_s6 + $0x1f0] sm:$0xff]  ;;  %v2215_v59 = vld [vmem:[%s2421_s6 + $0x200] sm:$0xff] }
 0x1fe   : > { %v1005_v14 = vpop.xlane.xlu0 %1004 }
 0x1ff   : > { %v1008_v20 = vpop.xlane.xlu1 %1007  ;;  %v1381_v24 = vmul.f32 %v2925_v12, %v1005_v14  ;;  %v1144_v14 = vsel %vm677_vm0, %v908_v15, 0.0  ;;  %v916_v15 = vmul.f32 %v2211_v63, %v2876_v36  ;;  %v2216_v63 = vld [vmem:[%s2421_s6 + $0x208] sm:$0xff] }
 0x200   : > { %v1382_v30 = vmul.f32 %v2925_v12, %v1008_v20  ;;  %v1011_v33 = vpop.xlane.xlu2 %1010  ;;  %v3041_v20 = vadd.s32 4294967184, %v2920_v8 }
 0x201   : > { %v1658_v37 = vperm.slane %v1381_v24, %v2984_v10  ;;  %v1383_v38 = vmul.f32 %v2925_v12, %v1011_v33 }
 0x202   : > { %v1662_v45 = vperm.slane %v1382_v30, %v2987_v11 }
 0x203   : > { %v1660_v40 = vsel %vm1659_vm7, %v1658_v37, %v1656_v9  ;;  %v1666_v41 = vperm.slane %v1383_v38, %v2993_v25  ;;  %1130 = vadd.xlane.f32.xlu0 %v1129_v39  ;;  %v913_v37 = vmul.f32 %v2208_v44, %v2876_v36  ;;  %v2209_v39 = vld [vmem:[%s2421_s6 + $0x1c8] sm:$0xff] }
 0x204   : > { %v1664_v46 = vsel %vm1663_vm8, %v1662_v45, %v1660_v40  ;;  %1142 = vadd.xlane.f32.xlu1 %v1141_v43  ;;  %v911_v40 = vmul.f32 %v2209_v39, %v2876_v36  ;;  %v2213_v44 = vld [vmem:[%s2421_s6 + $0x1e8] sm:$0xff] }
 0x205   : > { %v1668_v48 = vsel %vm1667_vm9, %v1666_v41, %v1664_v46  ;;  %1136 = vadd.xlane.f32.xlu2 %v1135_v47  ;;  %v810_v46 = vsub.f32 %v2764_v19, %v2886_v42  ;;  %v1159_v29 = vsel %vm677_vm0, %v913_v37, 0.0  ;;  %v915_v37 = vmul.f32 %v2213_v44, %v2876_v36 }
 0x206   : > { %v1014_v52 = vpop.xlane.xlu0 %1013  ;;  %v1153_v19 = vsel %vm677_vm0, %v911_v40, 0.0 }
 0x207   : > { %v1017_v57 = vpop.xlane.xlu1 %1016  ;;  %v1384_v56 = vmul.f32 %v2925_v12, %v1014_v52 }
 0x208   : > { %v1385_v61 = vmul.f32 %v2925_v12, %v1017_v57  ;;  %v1020_v62 = vpop.xlane.xlu2 %1019  ;;  %v822_v57 = vmul.f32 1.442695, %v810_v46 }
 0x209   : > { %v1670_v2 = vperm.slane %v1384_v56, %v3011_v21  ;;  %v1386_v3 = vmul.f32 %v2925_v12, %v1020_v62 }
 0x20a   : > { %v1674_v23 = vperm.slane %v1385_v61, %v3014_v51  ;;  %2133 = vpow2.f32 %v822_v57 }
 0x20b   : > { %v1672_v6 = vsel %vm1671_vm10, %v1670_v2, %v1668_v48  ;;  %v1678_v7 = vperm.slane %v1386_v3, %v3020_v58  ;;  %1139 = vadd.xlane.f32.xlu0 %v1138_v5 }
 0x20c   : > { %v1676_v9 = vsel %vm1675_vm11, %v1674_v23, %v1672_v6  ;;  %1151 = vadd.xlane.f32.xlu1 %v1150_v49  ;;  %v2212_v23 = vld [vmem:[%s2421_s6 + $0x1e0] sm:$0xff] }
 0x20d   : > { %v1680_v16 = vsel %vm3705_vm12, %v1678_v7, %v1676_v9  ;;  %1145 = vadd.xlane.f32.xlu2 %v1144_v14  ;;  %v914_v5 = vmul.f32 %v2212_v23, %v2876_v36  ;;  %v1156_v9 = vsel %vm677_vm0, %v912_v26, 0.0  ;;  %v811_v14 = vsub.f32 %v2766_v22, %v2897_v53 }
 0x20e   : > { %v1023_v24 = vpop.xlane.xlu0 %1022 }
 0x20f   : > { %v1026_v30 = vpop.xlane.xlu1 %1025  ;;  %v1387_v33 = vmul.f32 %v2925_v12, %v1023_v24  ;;  %v1168_v24 = vsel %vm677_vm0, %v916_v15, 0.0  ;;  %v1162_v1 = vsel %vm677_vm0, %v914_v5, 0.0 }
 0x210   : > { %v1388_v38 = vmul.f32 %v2925_v12, %v1026_v30  ;;  %v1029_v45 = vpop.xlane.xlu2 %1028 }
 0x211   : > { %v1682_v41 = vperm.slane %v1387_v33, %v3038_v17  ;;  %v1389_v43 = vmul.f32 %v2925_v12, %v1029_v45  ;;  %v3069_v12 = vpop.eup %2131 }
 0x212   : > { %v1686_v47 = vperm.slane %v1388_v38, %v3041_v20  ;;  %v824_v38 = vmul.f32 1.442695, %v811_v14  ;;  %v3093_v45 = vpop.eup %2133 }
 0x213   : > { %v1684_v48 = vsel %vm3704_vm13, %v1682_v41, %v1680_v16  ;;  %v1690_v52 = vperm.slane %v1389_v43, %v3047_v31  ;;  %1148 = vadd.xlane.f32.xlu0 %v1147_v4  ;;  %v2214_v41 = vld [vmem:[%s2421_s6 + $0x1f8] sm:$0xff]  ;;  %v918_v26 = vmul.f32 %v2215_v59, %v3093_v45  ;;  %v919_v15 = vmul.f32 %v2216_v63, %v3093_v45  ;;  %v2220_v59 = vld [vmem:[%s2421_s6 + $0x230] sm:$0xff] }
 0x214   : > { %v1688_v60 = vsel %vm1687_vm14, %v1686_v47, %v1684_v48  ;;  %1160 = vadd.xlane.f32.xlu1 %v1159_v29  ;;  %v917_v43 = vmul.f32 %v2214_v41, %v2876_v36  ;;  %v1165_v48 = vsel %vm677_vm0, %v915_v37, 0.0  ;;  %2135 = vpow2.f32 %v824_v38  ;;  %v2219_v41 = vld [vmem:[%s2421_s6 + $0x210] sm:$0xff]  ;;  %v2221_v63 = vld [vmem:[%s2421_s6 + $0x238] sm:$0xff] }
 0x215   : > { %v3067_v42 = vsel %vm1691_vm15, %v1690_v52, %v1688_v60  ;;  %1154 = vadd.xlane.f32.xlu2 %v1153_v19  ;;  %v842_v60 = vsel %vm677_vm0, %v3093_v45, 0.0 }
 0x216   : > { %v1032_v56 = vpop.xlane.xlu0 %1031  ;;  %v1171_v19 = vsel %vm677_vm0, %v917_v43, 0.0  ;;  %v920_v43 = vmul.f32 %v2219_v41, %v3093_v45 }
 0x217   : > { %v1035_v61 = vpop.xlane.xlu1 %1034  ;;  %v1390_v62 = vmul.f32 %v3069_v12, %v1032_v56 }
 0x218   : > { %v1391_v2 = vmul.f32 %v3069_v12, %v1035_v61  ;;  %v1038_v3 = vpop.xlane.xlu2 %1037 }
 0x219   : > { %v1693_v6 = vperm.slane %v1390_v62, %v2920_v8  ;;  %v1392_v7 = vmul.f32 %v3069_v12, %v1038_v3 }
 0x21a   : > { %v1694_v49 = vperm.slane %v1391_v2, %v2928_v13  ;;  %v3115_v23 = vpop.eup %2135 }
 0x21b   : > { %v1696_v16 = vperm.slane %v1392_v7, %v2932_v0  ;;  %1157 = vadd.xlane.f32.xlu0 %v1156_v9 }
 0x21c   : > { %v1695_v32 = vsel %vm1635_vm1, %v1694_v49, %v1693_v6  ;;  %1169 = vadd.xlane.f32.xlu1 %v1168_v24  ;;  %v1174_v49 = vsel %vm677_vm0, %v918_v26, 0.0  ;;  %v924_v26 = vmul.f32 %v2220_v59, %v3093_v45  ;;  %v2227_v59 = vld [vmem:[%s2421_s6 + $0x268] sm:$0xff] }
 0x21d   : > { %v1697_v30 = vsel %vm1639_vm2, %v1696_v16, %v1695_v32  ;;  %1163 = vadd.xlane.f32.xlu2 %v1162_v1  ;;  %v1177_v16 = vsel %vm677_vm0, %v919_v15, 0.0  ;;  %v845_v32 = vsel %vm677_vm0, %v3115_v23, 0.0  ;;  %v925_v15 = vmul.f32 %v2221_v63, %v3093_v45  ;;  %v2228_v63 = vld [vmem:[%s2421_s6 + $0x258] sm:$0xff] }
 0x21e   : > { %v1041_v33 = vpop.xlane.xlu0 %1040 }
 0x21f   : > { %v1044_v22 = vpop.xlane.xlu1 %1043  ;;  %v1393_v53 = vmul.f32 %v3069_v12, %v1041_v33  ;;  %v2217_v33 = vld [vmem:[%s2421_s6 + $0x218] sm:$0xff] }
 0x220   : > { %v1394_v39 = vmul.f32 %v3069_v12, %v1044_v22  ;;  %v1047_v40 = vpop.xlane.xlu2 %1046  ;;  %v921_v44 = vmul.f32 %v2217_v33, %v3093_v45  ;;  %v2218_v22 = vld [vmem:[%s2421_s6 + $0x220] sm:$0xff] }
 0x221   : > { %v1698_v46 = vperm.slane %v1393_v53, %v2938_v27  ;;  %v1395_v47 = vmul.f32 %v3069_v12, %v1047_v40  ;;  %v922_v53 = vmul.f32 %v2218_v22, %v3093_v45 }
 0x222   : > { %v1700_v4 = vperm.slane %v1394_v39, %v2957_v28 }
 0x223   : > { %v1699_v52 = vsel %vm1643_vm3, %v1698_v46, %v1697_v30  ;;  %v1702_v29 = vperm.slane %v1395_v47, %v2960_v50  ;;  %1166 = vadd.xlane.f32.xlu0 %v1165_v48  ;;  %v1183_v48 = vsel %vm677_vm0, %v921_v44, 0.0 }
 0x224   : > { %v1701_v36 = vsel %vm1647_vm4, %v1700_v4, %v1699_v52  ;;  %843 = vadd.xlane.f32.xlu1 %v842_v60  ;;  %v1186_v60 = vsel %vm677_vm0, %v922_v53, 0.0 }
 0x225   : > { %v1703_v57 = vsel %vm1651_vm5, %v1702_v29, %v1701_v36  ;;  %1172 = vadd.xlane.f32.xlu2 %v1171_v19  ;;  %v1180_v19 = vsel %vm677_vm0, %v920_v43, 0.0  ;;  %v2225_v43 = vld [vmem:[%s2421_s6 + $0x240] sm:$0xff] }
 0x226   : > { %v1050_v56 = vpop.xlane.xlu0 %1049 }
 0x227   : > { %v1053_v61 = vpop.xlane.xlu1 %1052  ;;  %v1396_v62 = vmul.f32 %v3069_v12, %v1050_v56 }
 0x228   : > { %v1397_v2 = vmul.f32 %v3069_v12, %v1053_v61  ;;  %v1056_v3 = vpop.xlane.xlu2 %1055 }
 0x229   : > { %v1704_v5 = vperm.slane %v1396_v62, %v2966_v18  ;;  %v1398_v6 = vmul.f32 %v3069_v12, %v1056_v3 }
 0x22a   : > { %v1706_v7 = vperm.slane %v1397_v2, %v2984_v10 }
 0x22b   : > { %v1705_v9 = vsel %vm1655_vm6, %v1704_v5, %v1703_v57  ;;  %v1708_v14 = vperm.slane %v1398_v6, %v2987_v11  ;;  %1175 = vadd.xlane.f32.xlu0 %v1174_v49  ;;  %v2222_v5 = vld [vmem:[%s2421_s6 + $0x228] sm:$0xff] }
 0x22c   : > { %v1707_v24 = vsel %vm1659_vm7, %v1706_v7, %v1705_v9  ;;  %1178 = vadd.xlane.f32.xlu1 %v1177_v16  ;;  %v923_v6 = vmul.f32 %v2222_v5, %v3093_v45 }
 0x22d   : > { %v1709_v1 = vsel %vm1663_vm8, %v1708_v14, %v1707_v24  ;;  %846 = vadd.xlane.f32.xlu2 %v845_v32  ;;  %v1192_v14 = vsel %vm677_vm0, %v924_v26, 0.0  ;;  %v1195_v32 = vsel %vm677_vm0, %v925_v15, 0.0  ;;  %v931_v26 = vmul.f32 %v2227_v59, %v3093_v45  ;;  %v2233_v59 = vld [vmem:[%s2421_s6 + $0x298] sm:$0xff] }
 0x22e   : > { %v1059_v30 = vpop.xlane.xlu0 %1058  ;;  %v929_v15 = vmul.f32 %v2228_v63, %v3093_v45 }
 0x22f   : > { %v1062_v37 = vpop.xlane.xlu1 %1061  ;;  %v1399_v38 = vmul.f32 %v3069_v12, %v1059_v30  ;;  %v1189_v30 = vsel %vm677_vm0, %v923_v6, 0.0 }
 0x230   : > { %v1400_v39 = vmul.f32 %v3069_v12, %v1062_v37  ;;  %v1065_v40 = vpop.xlane.xlu2 %1064  ;;  %v2223_v37 = vld [vmem:[%s2421_s6 + $0x248] sm:$0xff] }
 0x231   : > { %v1710_v46 = vperm.slane %v1399_v38, %v2993_v25  ;;  %v1401_v47 = vmul.f32 %v3069_v12, %v1065_v40  ;;  %v927_v38 = vmul.f32 %v2223_v37, %v3093_v45 }
 0x232   : > { %v1712_v4 = vperm.slane %v1400_v39, %v3011_v21  ;;  %v2224_v39 = vld [vmem:[%s2421_s6 + $0x250] sm:$0xff] }
 0x233   : > { %v1711_v52 = vsel %vm1667_vm9, %v1710_v46, %v1709_v1  ;;  %v1714_v29 = vperm.slane %v1401_v47, %v3014_v51  ;;  %1184 = vadd.xlane.f32.xlu0 %v1183_v48  ;;  %v928_v40 = vmul.f32 %v2224_v39, %v3093_v45  ;;  %v926_v46 = vmul.f32 %v2225_v43, %v3093_v45 }
 0x234   : > { %v1713_v36 = vsel %vm1671_vm10, %v1712_v4, %v1711_v52  ;;  %1187 = vadd.xlane.f32.xlu1 %v1186_v60  ;;  %v1201_v4 = vsel %vm677_vm0, %v927_v38, 0.0  ;;  %v2231_v38 = vld [vmem:[%s2421_s6 + $0x270] sm:$0xff] }
 0x235   : > { %v1715_v57 = vsel %vm1675_vm11, %v1714_v29, %v1713_v36  ;;  %1181 = vadd.xlane.f32.xlu2 %v1180_v19  ;;  %v1198_v29 = vsel %vm677_vm0, %v926_v46, 0.0  ;;  %v2226_v36 = vld [vmem:[%s2421_s6 + $0x260] sm:$0xff] }
 0x236   : > { %v1068_v56 = vpop.xlane.xlu0 %1067  ;;  %v930_v19 = vmul.f32 %v2226_v36, %v3093_v45 }
 0x237   : > { %v1071_v61 = vpop.xlane.xlu1 %1070  ;;  %v1402_v62 = vmul.f32 %v3069_v12, %v1068_v56 }
 0x238   : > { %v1403_v2 = vmul.f32 %v3069_v12, %v1071_v61  ;;  %v1074_v3 = vpop.xlane.xlu2 %1073  ;;  %v1210_v5 = vsel %vm677_vm0, %v930_v19, 0.0 }
 0x239   : > { %v1716_v7 = vperm.slane %v1402_v62, %v3020_v58  ;;  %v1404_v49 = vmul.f32 %v3069_v12, %v1074_v3 }
 0x23a   : > { %v1718_v9 = vperm.slane %v1403_v2, %v3038_v17 }
 0x23b   : > { %v1717_v16 = vsel %vm3705_vm12, %v1716_v7, %v1715_v57  ;;  %v1720_v24 = vperm.slane %v1404_v49, %v3041_v20  ;;  %1193 = vadd.xlane.f32.xlu0 %v1192_v14  ;;  %v1213_v7 = vsel %vm677_vm0, %v931_v26, 0.0  ;;  %v1207_v49 = vsel %vm677_vm0, %v929_v15, 0.0 }
 0x23c   : > { %v1719_v1 = vsel %vm3704_vm13, %v1718_v9, %v1717_v16  ;;  %1196 = vadd.xlane.f32.xlu1 %v1195_v32  ;;  %vm1910_vm13 = vcmask 1041409   ;;  %v2229_v16 = vld [vmem:[%s2421_s6 + $0x278] sm:$0xff]  ;;  %v937_v26 = vmul.f32 %v2233_v59, %v3115_v23 }
 0x23d   : > { %v1721_v33 = vsel %vm1687_vm14, %v1720_v24, %v1719_v1  ;;  %1190 = vadd.xlane.f32.xlu2 %v1189_v30  ;;  %v933_v24 = vmul.f32 %v2229_v16, %v3093_v45  ;;  %v2230_v30 = vld [vmem:[%s2421_s6 + $0x280] sm:$0xff] }
 0x23e   : > { %v1077_v44 = vpop.xlane.xlu0 %1076 }
 0x23f   : > { %v1080_v22 = vpop.xlane.xlu1 %1079  ;;  %v1405_v53 = vmul.f32 %v3069_v12, %v1077_v44  ;;  %v1204_v12 = vsel %vm677_vm0, %v928_v40, 0.0 }
 0x240   : > { %v838_v41 = vpop.xlane.xlu2 %837 }
 0x241   : > { %v1722_v47 = vperm.slane %v1405_v53, %v3047_v31  ;;  %2137 = vrcp.f32 %v838_v41  ;;  %v1219_v41 = vsel %vm677_vm0, %v933_v24, 0.0 }
 0x243   : > { %v1723_v48 = vsel %vm1691_vm15, %v1722_v47, %v1721_v33  ;;  %1202 = vadd.xlane.f32.xlu0 %v1201_v4  ;;  %v934_v33 = vmul.f32 %v2230_v30, %v3115_v23 }
 0x244   : > { %v3176_v52 = vsel %vm1910_vm13, %v1723_v48, %v3067_v42  ;;  %1205 = vadd.xlane.f32.xlu1 %v1204_v12  ;;  %vm3708_vm13 = vcmask 917312  }
 0x245   : > { %1199 = vadd.xlane.f32.xlu2 %v1198_v29  ;;  %v1222_v47 = vsel %vm677_vm0, %v934_v33, 0.0  ;;  %v2232_v29 = vld [vmem:[%s2421_s6 + $0x290] sm:$0xff] }
 0x246   : > { %v3179_v60 = vpop.xlane.xlu0 %840  ;;  %v936_v36 = vmul.f32 %v2232_v29, %v3115_v23 }
 0x247   : > { %v3183_v57 = vpop.eup %2137  ;;  %v1089_v56 = vpop.xlane.xlu1 %1088  ;;  %2139 = vrcp.f32 %v3179_v60 }
 0x248   : > { %v1409_v61 = vmul.f32 %v3183_v57, %v1089_v56  ;;  %v1406_v42 = vmul.f32 %v3183_v57, %v1080_v22  ;;  %v1083_v62 = vpop.xlane.xlu2 %1082  ;;  %v932_v22 = vmul.f32 %v2231_v38, %v3093_v45 }
 0x249   : > { %v1407_v2 = vmul.f32 %v3183_v57, %v1083_v62  ;;  %v2234_v62 = vld [vmem:[%s2421_s6 + $0x288] sm:$0xff] }
 0x24a   : > { %v1724_v3 = vperm.slane %v1406_v42, %v2920_v8  ;;  %v1729_v40 = vperm.slane %v1409_v61, %v2938_v27  ;;  %v1216_v45 = vsel %vm677_vm0, %v932_v22, 0.0  ;;  %v935_v63 = vmul.f32 %v2234_v62, %v3115_v23 }
 0x24b   : > { %v1725_v6 = vperm.slane %v1407_v2, %v2928_v13  ;;  %1211 = vadd.xlane.f32.xlu0 %v1210_v5  ;;  %v1228_v5 = vsel %vm677_vm0, %v936_v36, 0.0 }
 0x24c   : > { %1214 = vadd.xlane.f32.xlu1 %v1213_v7 }
 0x24d   : > { %v1726_v9 = vsel %vm1635_vm1, %v1725_v6, %v1724_v3  ;;  %1208 = vadd.xlane.f32.xlu2 %v1207_v49  ;;  %v1231_v49 = vsel %vm677_vm0, %v937_v26, 0.0 }
 0x24e   : > { %v1086_v14 = vpop.xlane.xlu0 %1085 }
 0x24f   : > { %v1098_v32 = vpop.xlane.xlu1 %1097  ;;  %v1408_v1 = vmul.f32 %v3183_v57, %v1086_v14  ;;  %v1225_v14 = vsel %vm677_vm0, %v935_v63, 0.0 }
 0x250   : > { %v1412_v44 = vmul.f32 %v3183_v57, %v1098_v32  ;;  %v1092_v37 = vpop.xlane.xlu2 %1091  ;;  %v2235_v32 = vld [vmem:[%s2421_s6 + $0x2a8] sm:$0xff] }
 0x251   : > { %v1727_v53 = vperm.slane %v1408_v1, %v2932_v0  ;;  %v1410_v39 = vmul.f32 %v3183_v57, %v1092_v37  ;;  %v939_v1 = vmul.f32 %v2235_v32, %v3115_v23 }
 0x252   : > { %v1735_v3 = vperm.slane %v1412_v44, %v2966_v18  ;;  %v2236_v44 = vld [vmem:[%s2421_s6 + $0x2b0] sm:$0xff] }
 0x253   : > { %v1728_v43 = vsel %vm1639_vm2, %v1727_v53, %v1726_v9  ;;  %v1731_v46 = vperm.slane %v1410_v39, %v2957_v28  ;;  %1220 = vadd.xlane.f32.xlu0 %v1219_v41  ;;  %v940_v37 = vmul.f32 %v2236_v44, %v3115_v23  ;;  %v2237_v53 = vld [vmem:[%s2421_s6 + $0x2a0] sm:$0xff]  ;;  %v812_v44 = vsub.f32 %v2772_v34, %v2901_v54 }
 0x254   : > { %v1730_v4 = vsel %vm1643_vm3, %v1729_v40, %v1728_v43  ;;  %1223 = vadd.xlane.f32.xlu1 %v1222_v47  ;;  %v938_v39 = vmul.f32 %v2237_v53, %v3115_v23  ;;  %v813_v34 = vsub.f32 %v2774_v35, %v2905_v55 }
 0x255   : > { %v1732_v48 = vsel %vm1647_vm4, %v1731_v46, %v1730_v4  ;;  %1217 = vadd.xlane.f32.xlu2 %v1216_v45  ;;  %v1237_v46 = vsel %vm677_vm0, %v939_v1, 0.0  ;;  %v1240_v45 = vsel %vm677_vm0, %v940_v37, 0.0  ;;  %v2241_v1 = vld [vmem:[%s2421_s6 + $0x2d8] sm:$0xff] }
 0x256   : > { %v1095_v12 = vpop.xlane.xlu0 %1094  ;;  %v828_v55 = vmul.f32 1.442695, %v813_v34 }
 0x257   : > { %v1107_v19 = vpop.xlane.xlu1 %1106  ;;  %v1411_v56 = vmul.f32 %v3183_v57, %v1095_v12  ;;  %v1234_v12 = vsel %vm677_vm0, %v938_v39, 0.0 }
 0x258   : > { %v1415_v61 = vmul.f32 %v3183_v57, %v1107_v19  ;;  %v1101_v42 = vpop.xlane.xlu2 %1100  ;;  %v2238_v19 = vld [vmem:[%s2421_s6 + $0x2c0] sm:$0xff] }
 0x259   : > { %v1733_v15 = vperm.slane %v1411_v56, %v2960_v50  ;;  %v1413_v2 = vmul.f32 %v3183_v57, %v1101_v42  ;;  %v942_v56 = vmul.f32 %v2238_v19, %v3115_v23  ;;  %v2244_v19 = vld [vmem:[%s2421_s6 + $0x2f0] sm:$0xff] }
 0x25a   : > { %v1741_v43 = vperm.slane %v1415_v61, %v2993_v25  ;;  %v2239_v61 = vld [vmem:[%s2421_s6 + $0x2c8] sm:$0xff] }
 0x25b   : > { %v1734_v6 = vsel %vm1651_vm5, %v1733_v15, %v1732_v48  ;;  %v1737_v7 = vperm.slane %v1413_v2, %v2984_v10  ;;  %1229 = vadd.xlane.f32.xlu0 %v1228_v5  ;;  %v943_v42 = vmul.f32 %v2239_v61, %v3115_v23  ;;  %v2240_v15 = vld [vmem:[%s2421_s6 + $0x2b8] sm:$0xff] }
 0x25c   : > { %v1736_v9 = vsel %vm1655_vm6, %v1735_v3, %v1734_v6  ;;  %1232 = vadd.xlane.f32.xlu1 %v1231_v49  ;;  %v941_v2 = vmul.f32 %v2240_v15, %v3115_v23  ;;  %v2245_v61 = vld [vmem:[%s2421_s6 + $0x2f8] sm:$0xff]  ;;  %v2246_v15 = vld [vmem:[%s2421_s6 + $0x2e8] sm:$0xff] }
 0x25d   : > { %v1738_v16 = vsel %vm1659_vm7, %v1737_v7, %v1736_v9  ;;  %1226 = vadd.xlane.f32.xlu2 %v1225_v14  ;;  %v1246_v7 = vsel %vm677_vm0, %v942_v56, 0.0  ;;  %v1249_v14 = vsel %vm677_vm0, %v943_v42, 0.0  ;;  %v948_v56 = vmul.f32 %v2244_v19, %v3115_v23 }
 0x25e   : > { %v1104_v24 = vpop.xlane.xlu0 %1103  ;;  %v1243_v60 = vsel %vm677_vm0, %v941_v2, 0.0  ;;  %v949_v42 = vmul.f32 %v2245_v61, %v3115_v23  ;;  %v947_v2 = vmul.f32 %v2246_v15, %v3115_v23 }
 0x25f   : > { %v1116_v30 = vpop.xlane.xlu1 %1115  ;;  %v1414_v33 = vmul.f32 %v3183_v57, %v1104_v24 }
 0x260   : > { %v1418_v38 = vmul.f32 %v3183_v57, %v1116_v30  ;;  %v1110_v22 = vpop.xlane.xlu2 %1109  ;;  %v945_v30 = vmul.f32 %v2241_v1, %v3115_v23 }
 0x261   : > { %v1739_v40 = vperm.slane %v1414_v33, %v2987_v11  ;;  %v1416_v41 = vmul.f32 %v3183_v57, %v1110_v22  ;;  %v3273_v33 = vpop.eup %2139  ;;  %v2242_v22 = vld [vmem:[%s2421_s6 + $0x2e0] sm:$0xff] }
 0x262   : > { %v1747_v6 = vperm.slane %v1418_v38, %v3020_v58  ;;  %v946_v53 = vmul.f32 %v2242_v22, %v3115_v23  ;;  %v2247_v22 = vld [vmem:[%s2421_s6 + $0x300] sm:$0xff] }
 0x263   : > { %v1740_v47 = vsel %vm1663_vm8, %v1739_v40, %v1738_v16  ;;  %v1743_v4 = vperm.slane %v1416_v41, %v3011_v21  ;;  %1238 = vadd.xlane.f32.xlu0 %v1237_v46  ;;  %v2243_v41 = vld [vmem:[%s2421_s6 + $0x2d0] sm:$0xff] }
 0x264   : > { %v1742_v48 = vsel %vm1667_vm9, %v1741_v43, %v1740_v47  ;;  %1241 = vadd.xlane.f32.xlu1 %v1240_v45  ;;  %v944_v43 = vmul.f32 %v2243_v41, %v3115_v23 }
 0x265   : > { %v1744_v29 = vsel %vm1671_vm10, %v1743_v4, %v1742_v48  ;;  %1235 = vadd.xlane.f32.xlu2 %v1234_v12  ;;  %v826_v4 = vmul.f32 1.442695, %v812_v44  ;;  %v1258_v48 = vsel %vm677_vm0, %v946_v53, 0.0 }
 0x266   : > { %v1113_v36 = vpop.xlane.xlu0 %1112 }
 0x267   : > { %v1125_v59 = vpop.xlane.xlu1 %1124  ;;  %v1417_v26 = vmul.f32 %v3183_v57, %v1113_v36  ;;  %2141 = vpow2.f32 %v826_v4 }
 0x268   : > { %v1421_v62 = vmul.f32 %v3183_v57, %v1125_v59  ;;  %v1119_v63 = vpop.xlane.xlu2 %1118  ;;  %2143 = vpow2.f32 %v828_v55 }
 0x269   : > { %v1745_v3 = vperm.slane %v1417_v26, %v3014_v51  ;;  %v1419_v5 = vmul.f32 %v3183_v57, %v1119_v63 }
 0x26a   : > { %v1753_v54 = vperm.slane %v1421_v62, %v3047_v31 }
 0x26b   : > { %v1746_v49 = vsel %vm1675_vm11, %v1745_v3, %v1744_v29  ;;  %v1749_v9 = vperm.slane %v1419_v5, %v3038_v17  ;;  %1247 = vadd.xlane.f32.xlu0 %v1246_v7  ;;  %v1252_v29 = vsel %vm677_vm0, %v944_v43, 0.0  ;;  %v1264_v7 = vsel %vm677_vm0, %v948_v56, 0.0 }
 0x26c   : > { %v1748_v16 = vsel %vm3705_vm12, %v1747_v6, %v1746_v49  ;;  %1250 = vadd.xlane.f32.xlu1 %v1249_v14  ;;  %v1267_v14 = vsel %vm677_vm0, %v949_v42, 0.0 }
 0x26d   : > { %v1750_v24 = vsel %vm3708_vm13, %v1749_v9, %v1748_v16  ;;  %1244 = vadd.xlane.f32.xlu2 %v1243_v60  ;;  %vm1912_vm13 = vcmask 1042434   ;;  %v1261_v16 = vsel %vm677_vm0, %v947_v2, 0.0  ;;  %v3314_v60 = vpop.eup %2141 }
 0x26e   : > { %v1122_v32 = vpop.xlane.xlu0 %1121  ;;  %v3318_v44 = vpop.eup %2143  ;;  %v950_v53 = vmul.f32 %v2247_v22, %v3314_v60  ;;  %v848_v43 = vsel %vm677_vm0, %v3314_v60, 0.0 }
 0x26f   : > { %v1134_v37 = vpop.xlane.xlu1 %1133  ;;  %v1420_v38 = vmul.f32 %v3183_v57, %v1122_v32  ;;  %v1255_v57 = vsel %vm677_vm0, %v945_v30, 0.0  ;;  %v851_v34 = vsel %vm677_vm0, %v3318_v44, 0.0 }
 0x270   : > { %v1424_v39 = vmul.f32 %v3273_v33, %v1134_v37  ;;  %v1128_v40 = vpop.xlane.xlu2 %1127 }
 0x271   : > { %v1751_v46 = vperm.slane %v1420_v38, %v3041_v20  ;;  %v1422_v47 = vmul.f32 %v3273_v33, %v1128_v40 }
 0x272   : > { %v1758_v6 = vperm.slane %v1424_v39, %v2932_v0 }
 0x273   : > { %v1752_v45 = vsel %vm1687_vm14, %v1751_v46, %v1750_v24  ;;  %1256 = vadd.xlane.f32.xlu0 %v1255_v57  ;;  %v1270_v57 = vsel %vm677_vm0, %v950_v53, 0.0 }
 0x274   : > { %v1754_v12 = vsel %vm1691_vm15, %v1753_v54, %v1752_v45  ;;  %1259 = vadd.xlane.f32.xlu1 %v1258_v48  ;;  %v2248_v48 = vld [vmem:[%s2421_s6 + $0x308] sm:$0xff] }
 0x275   : > { %1253 = vadd.xlane.f32.xlu2 %v1252_v29  ;;  %v3294_v35 = vsel %vm1912_vm13, %v1754_v12, %v3176_v52  ;;  %v1755_v52 = vperm.slane %v1422_v47, %v2920_v8  ;;  %v951_v12 = vmul.f32 %v2248_v48, %v3314_v60  ;;  %vm3709_vm13 = vcmask 917312  }
 0x276   : > { %v1131_v36 = vpop.xlane.xlu0 %1130 }
 0x277   : > { %v1143_v59 = vpop.xlane.xlu1 %1142  ;;  %v1423_v26 = vmul.f32 %v3273_v33, %v1131_v36  ;;  %v2249_v36 = vld [vmem:[%s2421_s6 + $0x310] sm:$0xff]  ;;  %v1273_v15 = vsel %vm677_vm0, %v951_v12, 0.0 }
 0x278   : > { %v1427_v62 = vmul.f32 %v3273_v33, %v1143_v59  ;;  %v1137_v63 = vpop.xlane.xlu2 %1136  ;;  %v952_v19 = vmul.f32 %v2249_v36, %v3314_v60 }
 0x279   : > { %v1756_v3 = vperm.slane %v1423_v26, %v2928_v13  ;;  %v1425_v5 = vmul.f32 %v3273_v33, %v1137_v63  ;;  %v2250_v26 = vld [vmem:[%s2421_s6 + $0x318] sm:$0xff] }
 0x27a   : > { %v1764_v41 = vperm.slane %v1427_v62, %v2960_v50  ;;  %v953_v61 = vmul.f32 %v2250_v26, %v3314_v60 }
 0x27b   : > { %v1757_v49 = vsel %vm1635_vm1, %v1756_v3, %v1755_v52  ;;  %v1760_v9 = vperm.slane %v1425_v5, %v2938_v27  ;;  %1265 = vadd.xlane.f32.xlu0 %v1264_v7  ;;  %v1276_v3 = vsel %vm677_vm0, %v952_v19, 0.0  ;;  %v2256_v19 = vld [vmem:[%s2421_s6 + $0x348] sm:$0xff] }
 0x27c   : > { %v1759_v23 = vsel %vm1639_vm2, %v1758_v6, %v1757_v49  ;;  %1268 = vadd.xlane.f32.xlu1 %v1267_v14  ;;  %v1279_v6 = vsel %vm677_vm0, %v953_v61, 0.0 }
 0x27d   : > { %v1761_v24 = vsel %vm1643_vm3, %v1760_v9, %v1759_v23  ;;  %1262 = vadd.xlane.f32.xlu2 %v1261_v16  ;;  %v2251_v9 = vld [vmem:[%s2421_s6 + $0x320] sm:$0xff] }
 0x27e   : > { %v1140_v32 = vpop.xlane.xlu0 %1139  ;;  %v954_v14 = vmul.f32 %v2251_v9, %v3314_v60 }
 0x27f   : > { %v1152_v1 = vpop.xlane.xlu1 %1151  ;;  %v1426_v30 = vmul.f32 %v3273_v33, %v1140_v32 }
 0x280   : > { %v1430_v37 = vmul.f32 %v3273_v33, %v1152_v1  ;;  %v1146_v38 = vpop.xlane.xlu2 %1145 }
 0x281   : > { %v1762_v39 = vperm.slane %v1426_v30, %v2957_v28  ;;  %v1428_v40 = vmul.f32 %v3273_v33, %v1146_v38 }
 0x282   : > { %v1770_v63 = vperm.slane %v1430_v37, %v2987_v11  ;;  %v2253_v37 = vld [vmem:[%s2421_s6 + $0x330] sm:$0xff] }
 0x283   : > { %v1763_v46 = vsel %vm1647_vm4, %v1762_v39, %v1761_v24  ;;  %v1766_v47 = vperm.slane %v1428_v40, %v2966_v18  ;;  %849 = vadd.xlane.f32.xlu0 %v848_v43  ;;  %v2252_v24 = vld [vmem:[%s2421_s6 + $0x328] sm:$0xff]  ;;  %v956_v38 = vmul.f32 %v2253_v37, %v3314_v60  ;;  %v1282_v40 = vsel %vm677_vm0, %v954_v14, 0.0 }
 0x284   : > { %v1765_v54 = vsel %vm1651_vm5, %v1764_v41, %v1763_v46  ;;  %852 = vadd.xlane.f32.xlu1 %v851_v34  ;;  %v955_v32 = vmul.f32 %v2252_v24, %v3314_v60 }
 0x285   : > { %v1767_v4 = vsel %vm1655_vm6, %v1766_v47, %v1765_v54  ;;  %1271 = vadd.xlane.f32.xlu2 %v1270_v57  ;;  %v1288_v34 = vsel %vm677_vm0, %v956_v38, 0.0 }
 0x286   : > { %v1149_v45 = vpop.xlane.xlu0 %1148  ;;  %v1285_v46 = vsel %vm677_vm0, %v955_v32, 0.0 }
 0x287   : > { %v1161_v29 = vpop.xlane.xlu1 %1160  ;;  %v1429_v55 = vmul.f32 %v3273_v33, %v1149_v45 }
 0x288   : > { %v1433_v56 = vmul.f32 %v3273_v33, %v1161_v29  ;;  %v1155_v59 = vpop.xlane.xlu2 %1154  ;;  %v2255_v29 = vld [vmem:[%s2421_s6 + $0x340] sm:$0xff] }
 0x289   : > { %v1768_v42 = vperm.slane %v1429_v55, %v2984_v10  ;;  %v1431_v62 = vmul.f32 %v3273_v33, %v1155_v59  ;;  %v958_v55 = vmul.f32 %v2255_v29, %v3314_v60 }
 0x28a   : > { %v1776_v39 = vperm.slane %v1433_v56, %v3014_v51  ;;  %v959_v56 = vmul.f32 %v2256_v19, %v3314_v60 }
 0x28b   : > { %v1769_v2 = vsel %vm1659_vm7, %v1768_v42, %v1767_v4  ;;  %v1772_v52 = vperm.slane %v1431_v62, %v2993_v25  ;;  %1274 = vadd.xlane.f32.xlu0 %v1273_v15  ;;  %v2254_v4 = vld [vmem:[%s2421_s6 + $0x338] sm:$0xff]  ;;  %v1294_v15 = vsel %vm677_vm0, %v958_v55, 0.0 }
 0x28c   : > { %v1771_v5 = vsel %vm1663_vm8, %v1770_v63, %v1769_v2  ;;  %1277 = vadd.xlane.f32.xlu1 %v1276_v3  ;;  %v957_v45 = vmul.f32 %v2254_v4, %v3314_v60 }
 0x28d   : > { %v1773_v7 = vsel %vm1667_vm9, %v1772_v52, %v1771_v5  ;;  %1280 = vadd.xlane.f32.xlu2 %v1279_v6 }
 0x28e   : > { %v1158_v49 = vpop.xlane.xlu0 %1157  ;;  %v1291_v42 = vsel %vm677_vm0, %v957_v45, 0.0  ;;  %v2262_v45 = vld [vmem:[%s2421_s6 + $0x398] sm:$0xff] }
 0x28f   : > { %v1170_v23 = vpop.xlane.xlu1 %1169  ;;  %v1432_v16 = vmul.f32 %v3273_v33, %v1158_v49 }
 0x290   : > { %v1436_v1 = vmul.f32 %v3273_v33, %v1170_v23  ;;  %v1164_v30 = vpop.xlane.xlu2 %1163  ;;  %v2258_v23 = vld [vmem:[%s2421_s6 + $0x358] sm:$0xff] }
 0x291   : > { %v1774_v22 = vperm.slane %v1432_v16, %v3011_v21  ;;  %v1434_v53 = vmul.f32 %v3273_v33, %v1164_v30  ;;  %v961_v16 = vmul.f32 %v2258_v23, %v3314_v60 }
 0x292   : > { %v1782_v61 = vperm.slane %v1436_v1, %v3041_v20  ;;  %v2259_v1 = vld [vmem:[%s2421_s6 + $0x380] sm:$0xff] }
 0x293   : > { %v1775_v41 = vsel %vm1671_vm10, %v1774_v22, %v1773_v7  ;;  %v1778_v43 = vperm.slane %v1434_v53, %v3020_v58  ;;  %1283 = vadd.xlane.f32.xlu0 %v1282_v40  ;;  %v2257_v7 = vld [vmem:[%s2421_s6 + $0x350] sm:$0xff]  ;;  %v1303_v22 = vsel %vm677_vm0, %v961_v16, 0.0 }
 0x294   : > { %v1777_v47 = vsel %vm1675_vm11, %v1776_v39, %v1775_v41  ;;  %1286 = vadd.xlane.f32.xlu1 %v1285_v46  ;;  %v960_v49 = vmul.f32 %v2257_v7, %v3314_v60  ;;  %v2260_v41 = vld [vmem:[%s2421_s6 + $0x388] sm:$0xff] }
 0x295   : > { %v1779_v54 = vsel %vm3705_vm12, %v1778_v43, %v1777_v47  ;;  %1289 = vadd.xlane.f32.xlu2 %v1288_v34  ;;  %vm1914_vm12 = vcmask 1043459   ;;  %v967_v43 = vmul.f32 %v2260_v41, %v3318_v44  ;;  %v2261_v34 = vld [vmem:[%s2421_s6 + $0x390] sm:$0xff] }
 0x296   : > { %v1167_v57 = vpop.xlane.xlu0 %1166  ;;  %v1300_v38 = vsel %vm677_vm0, %v960_v49, 0.0 }
 0x297   : > { %v1435_v48 = vmul.f32 %v3273_v33, %v1167_v57  ;;  %v844_v12 = vpop.xlane.xlu1 %843  ;;  %v1321_v29 = vsel %vm677_vm0, %v967_v43, 0.0 }
 0x298   : > { %2145 = vrcp.f32 %v844_v12  ;;  %v1173_v36 = vpop.xlane.xlu2 %1172 }
 0x299   : > { %v1780_v59 = vperm.slane %v1435_v48, %v3038_v17  ;;  %v1437_v26 = vmul.f32 %v3273_v33, %v1173_v36  ;;  %v1297_v33 = vsel %vm677_vm0, %v959_v56, 0.0  ;;  %v969_v48 = vmul.f32 %v2262_v45, %v3318_v44 }
 0x29b   : > { %v1781_v62 = vsel %vm3709_vm13, %v1780_v59, %v1779_v54  ;;  %v1784_v63 = vperm.slane %v1437_v26, %v3047_v31  ;;  %1292 = vadd.xlane.f32.xlu0 %v1291_v42  ;;  %v968_v54 = vmul.f32 %v2261_v34, %v3318_v44  ;;  %v1327_v56 = vsel %vm677_vm0, %v969_v48, 0.0 }
 0x29c   : > { %v1783_v2 = vsel %vm1687_vm14, %v1782_v61, %v1781_v62  ;;  %1295 = vadd.xlane.f32.xlu1 %v1294_v15  ;;  %v2263_v62 = vld [vmem:[%s2421_s6 + $0x3a0] sm:$0xff] }
 0x29d   : > { %v1785_v52 = vsel %vm1691_vm15, %v1784_v63, %v1783_v2  ;;  %1298 = vadd.xlane.f32.xlu2 %v1297_v33  ;;  %v1324_v36 = vsel %vm677_vm0, %v968_v54, 0.0  ;;  %v970_v63 = vmul.f32 %v2263_v62, %v3318_v44 }
 0x29e   : > { %v3388_v3 = vpop.eup %2145  ;;  %v3391_v5 = vsel %vm1914_vm12, %v1785_v52, %v3294_v35  ;;  %v1176_v6 = vpop.xlane.xlu0 %1175  ;;  %v966_v35 = vmul.f32 %v2259_v1, %v3318_v44  ;;  %v2264_v52 = vld [vmem:[%s2421_s6 + $0x3a8] sm:$0xff]  ;;  %vm3710_vm12 = vcmask 851712  }
 0x29f   : > { %v1438_v9 = vmul.f32 %v3388_v3, %v1176_v6  ;;  %v1179_v14 = vpop.xlane.xlu1 %1178  ;;  %v971_v6 = vmul.f32 %v2264_v52, %v3318_v44  ;;  %v1330_v16 = vsel %vm677_vm0, %v970_v63, 0.0 }
 0x2a0   : > { %v1439_v24 = vmul.f32 %v3388_v3, %v1179_v14  ;;  %v3399_v32 = vpop.xlane.xlu2 %846  ;;  %v1318_v39 = vsel %vm677_vm0, %v966_v35, 0.0 }
 0x2a1   : > { %v1786_v30 = vperm.slane %v1438_v9, %v2920_v8  ;;  %v2265_v9 = vld [vmem:[%s2421_s6 + $0x3b0] sm:$0xff]  ;;  %v1333_v1 = vsel %vm677_vm0, %v971_v6, 0.0  ;;  %2147 = vrcp.f32 %v3399_v32 }
 0x2a2   : > { %v1787_v37 = vperm.slane %v1439_v24, %v2928_v13  ;;  %v972_v14 = vmul.f32 %v2265_v9, %v3318_v44 }
 0x2a3   : > { %1301 = vadd.xlane.f32.xlu0 %v1300_v38 }
 0x2a4   : > { %v1788_v53 = vsel %vm1635_vm1, %v1787_v37, %v1786_v30  ;;  %1304 = vadd.xlane.f32.xlu1 %v1303_v22  ;;  %v1336_v30 = vsel %vm677_vm0, %v972_v14, 0.0 }
 0x2a5   : > { %1319 = vadd.xlane.f32.xlu2 %v1318_v39  ;;  %v2266_v39 = vld [vmem:[%s2421_s6 + $0x3b8] sm:$0xff] }
 0x2a6   : > { %v1185_v40 = vpop.xlane.xlu0 %1184 }
 0x2a7   : > { %v1441_v46 = vmul.f32 %v3388_v3, %v1185_v40  ;;  %v1188_v47 = vpop.xlane.xlu1 %1187  ;;  %v973_v40 = vmul.f32 %v2266_v39, %v3318_v44  ;;  %v3483_v39 = vpop.eup %2147 }
 0x2a8   : > { %v1442_v57 = vmul.f32 %v3388_v3, %v1188_v47  ;;  %v1182_v4 = vpop.xlane.xlu2 %1181  ;;  %v2267_v47 = vld [vmem:[%s2421_s6 + $0x3c0] sm:$0xff] }
 0x2a9   : > { %v1440_v12 = vmul.f32 %v3388_v3, %v1182_v4  ;;  %v1791_v19 = vperm.slane %v1441_v46, %v2938_v27  ;;  %v974_v34 = vmul.f32 %v2267_v47, %v3318_v44  ;;  %v2268_v4 = vld [vmem:[%s2421_s6 + $0x3c8] sm:$0xff] }
 0x2aa   : > { %v1793_v59 = vperm.slane %v1442_v57, %v2957_v28  ;;  %v975_v45 = vmul.f32 %v2268_v4, %v3318_v44 }
 0x2ab   : > { %v1789_v55 = vperm.slane %v1440_v12, %v2932_v0  ;;  %1322 = vadd.xlane.f32.xlu0 %v1321_v29  ;;  %v1339_v12 = vsel %vm677_vm0, %v973_v40, 0.0 }
 0x2ac   : > { %1325 = vadd.xlane.f32.xlu1 %v1324_v36 }
 0x2ad   : > { %v1790_v26 = vsel %vm1639_vm2, %v1789_v55, %v1788_v53  ;;  %1328 = vadd.xlane.f32.xlu2 %v1327_v56  ;;  %v1342_v55 = vsel %vm677_vm0, %v974_v34, 0.0 }
 0x2ae   : > { %v1792_v61 = vsel %vm1643_vm3, %v1791_v19, %v1790_v26  ;;  %v1194_v42 = vpop.xlane.xlu0 %1193  ;;  %v1345_v19 = vsel %vm677_vm0, %v975_v45, 0.0 }
 0x2af   : > { %v1444_v15 = vmul.f32 %v3388_v3, %v1194_v42  ;;  %v1197_v2 = vpop.xlane.xlu1 %1196  ;;  %v1794_v33 = vsel %vm1647_vm4, %v1793_v59, %v1792_v61  ;;  %v2269_v42 = vld [vmem:[%s2421_s6 + $0x3d0] sm:$0xff] }
 0x2b0   : > { %v1445_v7 = vmul.f32 %v3388_v3, %v1197_v2  ;;  %v1191_v49 = vpop.xlane.xlu2 %1190  ;;  %v976_v62 = vmul.f32 %v2269_v42, %v3318_v44 }
 0x2b1   : > { %v1443_v23 = vmul.f32 %v3388_v3, %v1191_v49  ;;  %v1797_v35 = vperm.slane %v1444_v15, %v2966_v18  ;;  %v2271_v49 = vld [vmem:[%s2421_s6 + $0x3d8] sm:$0xff] }
 0x2b2   : > { %v1799_v37 = vperm.slane %v1445_v7, %v2984_v10  ;;  %v977_v9 = vmul.f32 %v2271_v49, %v3318_v44 }
 0x2b3   : > { %v1795_v24 = vperm.slane %v1443_v23, %v2960_v50  ;;  %1331 = vadd.xlane.f32.xlu0 %v1330_v16  ;;  %v1348_v23 = vsel %vm677_vm0, %v976_v62, 0.0  ;;  %v2276_v62 = vld [vmem:[%s2421_s6 + $0x378] sm:$0xff] }
 0x2b4   : > { %1334 = vadd.xlane.f32.xlu1 %v1333_v1 }
 0x2b5   : > { %v1796_v38 = vsel %vm1651_vm5, %v1795_v24, %v1794_v33  ;;  %1337 = vadd.xlane.f32.xlu2 %v1336_v30  ;;  %v2270_v33 = vld [vmem:[%s2421_s6 + $0x360] sm:$0xff] }
 0x2b6   : > { %v1798_v22 = vsel %vm1655_vm6, %v1797_v35, %v1796_v38  ;;  %v1203_v53 = vpop.xlane.xlu0 %1202  ;;  %v962_v52 = vmul.f32 %v2270_v33, %v3314_v60  ;;  %v1351_v35 = vsel %vm677_vm0, %v977_v9, 0.0 }
 0x2b7   : > { %v1447_v41 = vmul.f32 %v3388_v3, %v1203_v53  ;;  %v1206_v43 = vpop.xlane.xlu1 %1205  ;;  %v1800_v46 = vsel %vm1659_vm7, %v1799_v37, %v1798_v22  ;;  %v2272_v22 = vld [vmem:[%s2421_s6 + $0x368] sm:$0xff] }
 0x2b8   : > { %v1448_v54 = vmul.f32 %v3388_v3, %v1206_v43  ;;  %v1200_v57 = vpop.xlane.xlu2 %1199  ;;  %v1306_v24 = vsel %vm677_vm0, %v962_v52, 0.0  ;;  %v963_v53 = vmul.f32 %v2272_v22, %v3314_v60  ;;  %v2277_v52 = vld [vmem:[%s2421_s6 + $0x3f0] sm:$0xff] }
 0x2b9   : > { %v1446_v48 = vmul.f32 %v3388_v3, %v1200_v57  ;;  %v1803_v36 = vperm.slane %v1447_v41, %v2993_v25  ;;  %v2274_v57 = vld [vmem:[%s2421_s6 + $0x370] sm:$0xff] }
 0x2ba   : > { %v1805_v56 = vperm.slane %v1448_v54, %v3011_v21  ;;  %v964_v4 = vmul.f32 %v2274_v57, %v3314_v60 }
 0x2bb   : > { %v1801_v29 = vperm.slane %v1446_v48, %v2987_v11  ;;  %1340 = vadd.xlane.f32.xlu0 %v1339_v12  ;;  %v1309_v48 = vsel %vm677_vm0, %v963_v53, 0.0 }
 0x2bc   : > { %1343 = vadd.xlane.f32.xlu1 %v1342_v55 }
 0x2bd   : > { %v1802_v59 = vsel %vm1663_vm8, %v1801_v29, %v1800_v46  ;;  %1346 = vadd.xlane.f32.xlu2 %v1345_v19  ;;  %v2273_v46 = vld [vmem:[%s2421_s6 + $0x3e0] sm:$0xff] }
 0x2be   : > { %v1804_v26 = vsel %vm1667_vm9, %v1803_v36, %v1802_v59  ;;  %v1212_v61 = vpop.xlane.xlu0 %1211  ;;  %v978_v47 = vmul.f32 %v2273_v46, %v3318_v44  ;;  %v1312_v36 = vsel %vm677_vm0, %v964_v4, 0.0  ;;  %v2275_v59 = vld [vmem:[%s2421_s6 + $0x3e8] sm:$0xff] }
 0x2bf   : > { %v1450_v63 = vmul.f32 %v3388_v3, %v1212_v61  ;;  %v1215_v15 = vpop.xlane.xlu1 %1214  ;;  %v1806_v2 = vsel %vm1671_vm10, %v1805_v56, %v1804_v26  ;;  %v979_v26 = vmul.f32 %v2275_v59, %v3318_v44 }
 0x2c0   : > { %v1451_v6 = vmul.f32 %v3388_v3, %v1215_v15  ;;  %v1209_v7 = vpop.xlane.xlu2 %1208  ;;  %v1354_v29 = vsel %vm677_vm0, %v978_v47, 0.0 }
 0x2c1   : > { %v1449_v14 = vmul.f32 %v3388_v3, %v1209_v7  ;;  %v1809_v1 = vperm.slane %v1450_v63, %v3020_v58  ;;  %v965_v63 = vmul.f32 %v2276_v62, %v3314_v60  ;;  %v1357_v49 = vsel %vm677_vm0, %v979_v26, 0.0 }
 0x2c2   : > { %v1811_v30 = vperm.slane %v1451_v6, %v3038_v17  ;;  %v980_v6 = vmul.f32 %v2277_v52, %v3318_v44 }
 0x2c3   : > { %v1807_v16 = vperm.slane %v1449_v14, %v3014_v51  ;;  %1349 = vadd.xlane.f32.xlu0 %v1348_v23  ;;  %v1315_v60 = vsel %vm677_vm0, %v965_v63, 0.0 }
 0x2c4   : > { %1307 = vadd.xlane.f32.xlu1 %v1306_v24  ;;  %v1360_v23 = vsel %vm677_vm0, %v980_v6, 0.0 }
 0x2c5   : > { %v1808_v32 = vsel %vm1675_vm11, %v1807_v16, %v1806_v2  ;;  %1352 = vadd.xlane.f32.xlu2 %v1351_v35 }
 0x2c6   : > { %v1810_v37 = vsel %vm3710_vm12, %v1809_v1, %v1808_v32  ;;  %v1221_v38 = vpop.xlane.xlu0 %1220  ;;  %vm1916_vm12 = vcmask 1044484  }
 0x2c7   : > { %v1453_v40 = vmul.f32 %v3388_v3, %v1221_v38  ;;  %v1224_v41 = vpop.xlane.xlu1 %1223  ;;  %v1812_v43 = vsel %vm3709_vm13, %v1811_v30, %v1810_v37  ;;  %v2278_v30 = vld [vmem:[%s2421_s6 + $0x3f8] sm:$0xff]  ;;  %s191_s6 = sand.u32 1, %s2333_s16  }
 0x2c8   : > { %v1454_v34 = vmul.f32 %v3483_v39, %v1224_v41  ;;  %v1218_v54 = vpop.xlane.xlu2 %1217  ;;  %v981_v32 = vmul.f32 %v2278_v30, %v3318_v44  ;;  %s2005_s19 = sshll.u32 %s191_s6, 3  ;;  %s1927_s27 = scalar_lea.sflag [#allocation3], %s191_s6 }
 0x2c9   : > { %v1452_v45 = vmul.f32 %v3388_v3, %v1218_v54  ;;  %v1815_v55 = vperm.slane %v1453_v40, %v3047_v31  ;;  %s193_s28 = scalar_lea.vmem [#allocation2], %s2005_s19 }
 0x2ca   : > { %v1817_v9 = vperm.slane %v1454_v34, %v2920_v8  ;;  %s1939_s29 = sshll.u32 %s193_s28, 4  ;;  %s1940_s29 = int_to_ptr.vmem [resolvable:$true] %s1939_s29 }
 0x2cb   : > { %v1813_v12 = vperm.slane %v1452_v45, %v3041_v20  ;;  %1310 = vadd.xlane.f32.xlu0 %v1309_v48 }
 0x2cc   : > { %1355 = vadd.xlane.f32.xlu1 %v1354_v29 }
 0x2cd   : > { %v1814_v19 = vsel %vm1687_vm14, %v1813_v12, %v1812_v43  ;;  %1313 = vadd.xlane.f32.xlu2 %v1312_v36  ;;  %v1363_v43 = vsel %vm677_vm0, %v981_v32, 0.0  ;;  %vm3711_vm0 = vcmask 851712  }
 0x2ce   : > { %v1816_v3 = vsel %vm1691_vm15, %v1815_v55, %v1814_v19  ;;  %v1230_v56 = vpop.xlane.xlu0 %1229 }
 0x2cf   : > { %v1456_v61 = vmul.f32 %v3483_v39, %v1230_v56  ;;  %v1233_v42 = vpop.xlane.xlu1 %1232  ;;  %v3506_v15 = vsel %vm1916_vm12, %v1816_v3, %v3391_v5  ;;  %vm1918_vm12 = vcmask 1045509  }
 0x2d0   : > { %v1457_v2 = vmul.f32 %v3483_v39, %v1233_v42  ;;  %v1227_v33 = vpop.xlane.xlu2 %1226 }
 0x2d1   : > { %v1455_v7 = vmul.f32 %v3483_v39, %v1227_v33  ;;  %v1820_v5 = vperm.slane %v1456_v61, %v2932_v0 }
 0x2d2   : > { %v1822_v16 = vperm.slane %v1457_v2, %v2938_v27 }
 0x2d3   : > { %v1818_v14 = vperm.slane %v1455_v7, %v2928_v13  ;;  %1358 = vadd.xlane.f32.xlu0 %v1357_v49 }
 0x2d4   : > { %1316 = vadd.xlane.f32.xlu1 %v1315_v60 }
 0x2d5   : > { %v1819_v24 = vsel %vm1635_vm1, %v1818_v14, %v1817_v9  ;;  %1361 = vadd.xlane.f32.xlu2 %v1360_v23 }
 0x2d6   : > { %v1821_v1 = vsel %vm1639_vm2, %v1820_v5, %v1819_v24  ;;  %v1239_v35 = vpop.xlane.xlu0 %1238 }
 0x2d7   : > { %v1459_v37 = vmul.f32 %v3483_v39, %v1239_v35  ;;  %v1242_v38 = vpop.xlane.xlu1 %1241  ;;  %v1823_v22 = vsel %vm1643_vm3, %v1822_v16, %v1821_v1 }
 0x2d8   : > { %v1460_v53 = vmul.f32 %v3483_v39, %v1242_v38  ;;  %v1236_v40 = vpop.xlane.xlu2 %1235 }
 0x2d9   : > { %v1458_v41 = vmul.f32 %v3483_v39, %v1236_v40  ;;  %v1826_v47 = vperm.slane %v1459_v37, %v2960_v50 }
 0x2da   : > { %v1828_v34 = vperm.slane %v1460_v53, %v2966_v18 }
 0x2db   : > { %v1824_v46 = vperm.slane %v1458_v41, %v2957_v28  ;;  %1364 = vadd.xlane.f32.xlu0 %v1363_v43 }
 0x2dd   : > { %v1825_v44 = vsel %vm1647_vm4, %v1824_v46, %v1823_v22 }
 0x2de   : > { %v1827_v54 = vsel %vm1651_vm5, %v1826_v47, %v1825_v44  ;;  %v1248_v57 = vpop.xlane.xlu0 %1247 }
 0x2df   : > { %v1462_v4 = vmul.f32 %v3483_v39, %v1248_v57  ;;  %v1251_v45 = vpop.xlane.xlu1 %1250  ;;  %v1829_v48 = vsel %vm1655_vm6, %v1828_v34, %v1827_v54 }
 0x2e0   : > { %v1463_v12 = vmul.f32 %v3483_v39, %v1251_v45  ;;  %v1245_v29 = vpop.xlane.xlu2 %1244 }
 0x2e1   : > { %v1461_v55 = vmul.f32 %v3483_v39, %v1245_v29  ;;  %v1832_v19 = vperm.slane %v1462_v4, %v2987_v11 }
 0x2e2   : > { %v1834_v3 = vperm.slane %v1463_v12, %v2993_v25 }
 0x2e3   : > { %v1830_v36 = vperm.slane %v1461_v55, %v2984_v10 }
 0x2e5   : > { %v1831_v56 = vsel %vm1659_vm7, %v1830_v36, %v1829_v48 }
 0x2e6   : > { %v1833_v59 = vsel %vm1663_vm8, %v1832_v19, %v1831_v56  ;;  %v1257_v26 = vpop.xlane.xlu0 %1256 }
 0x2e7   : > { %v1465_v61 = vmul.f32 %v3483_v39, %v1257_v26  ;;  %v1260_v42 = vpop.xlane.xlu1 %1259  ;;  %v1835_v62 = vsel %vm1667_vm9, %v1834_v3, %v1833_v59 }
 0x2e8   : > { %v1466_v63 = vmul.f32 %v3483_v39, %v1260_v42  ;;  %v1254_v2 = vpop.xlane.xlu2 %1253 }
 0x2e9   : > { %v1464_v33 = vmul.f32 %v3483_v39, %v1254_v2  ;;  %v1838_v6 = vperm.slane %v1465_v61, %v3014_v51 }
 0x2ea   : > { %v1840_v7 = vperm.slane %v1466_v63, %v3020_v58 }
 0x2eb   : > { %v1836_v52 = vperm.slane %v1464_v33, %v3011_v21 }
 0x2ed   : > { %v1837_v49 = vsel %vm1671_vm10, %v1836_v52, %v1835_v62 }
 0x2ee   : > { %v1839_v9 = vsel %vm1675_vm11, %v1838_v6, %v1837_v49  ;;  %v1266_v14 = vpop.xlane.xlu0 %1265 }
 0x2ef   : > { %v1468_v60 = vmul.f32 %v3483_v39, %v1266_v14  ;;  %v1269_v5 = vpop.xlane.xlu1 %1268  ;;  %v1841_v23 = vsel %vm3711_vm0, %v1840_v7, %v1839_v9 }
 0x2f0   : > { %v1469_v16 = vmul.f32 %v3483_v39, %v1269_v5  ;;  %v1263_v24 = vpop.xlane.xlu2 %1262 }
 0x2f1   : > { %v1467_v1 = vmul.f32 %v3483_v39, %v1263_v24  ;;  %v1844_v30 = vperm.slane %v1468_v60, %v3041_v20 }
 0x2f2   : > { %v1846_v32 = vperm.slane %v1469_v16, %v3047_v31 }
 0x2f3   : > { %v1842_v35 = vperm.slane %v1467_v1, %v3038_v17 }
 0x2f5   : > { %v1843_v37 = vsel %vm3709_vm13, %v1842_v35, %v1841_v23 }
 0x2f6   : > { %v1845_v38 = vsel %vm1687_vm14, %v1844_v30, %v1843_v37  ;;  %v850_v22 = vpop.xlane.xlu0 %849 }
 0x2f7   : > { %2149 = vrcp.f32 %v850_v22  ;;  %v853_v53 = vpop.xlane.xlu1 %852  ;;  %v1847_v40 = vsel %vm1691_vm15, %v1846_v32, %v1845_v38 }
 0x2f8   : > { %v1272_v41 = vpop.xlane.xlu2 %1271  ;;  %v3562_v43 = vsel %vm1918_vm12, %v1847_v40, %v3506_v15  ;;  %2151 = vrcp.f32 %v853_v53 }
 0x2fd   : > { %v3564_v39 = vpop.eup %2149 }
 0x2fe   : > { %v1470_v46 = vmul.f32 %v3564_v39, %v1272_v41  ;;  %v1275_v47 = vpop.xlane.xlu0 %1274 }
 0x2ff   : > { %v1471_v34 = vmul.f32 %v3564_v39, %v1275_v47  ;;  %v1278_v44 = vpop.xlane.xlu1 %1277 }
 0x300   : > { %v1848_v54 = vperm.slane %v1470_v46, %v2920_v8  ;;  %v1472_v57 = vmul.f32 %v3564_v39, %v1278_v44  ;;  %v1281_v4 = vpop.xlane.xlu2 %1280 }
 0x301   : > { %v1849_v45 = vperm.slane %v1471_v34, %v2928_v13  ;;  %v1473_v48 = vmul.f32 %v3564_v39, %v1281_v4 }
 0x302   : > { %v1851_v15 = vperm.slane %v1472_v57, %v2932_v0 }
 0x303   : > { %v1850_v12 = vsel %vm1635_vm1, %v1849_v45, %v1848_v54  ;;  %v1853_v29 = vperm.slane %v1473_v48, %v2938_v27  ;;  %v3601_v48 = vpop.eup %2151 }
 0x304   : > { %v1852_v55 = vsel %vm1639_vm2, %v1851_v15, %v1850_v12 }
 0x305   : > { %v1854_v36 = vsel %vm1643_vm3, %v1853_v29, %v1852_v55 }
 0x306   : > { %v1284_v19 = vpop.xlane.xlu0 %1283 }
 0x307   : > { %v1474_v3 = vmul.f32 %v3564_v39, %v1284_v19  ;;  %v1287_v56 = vpop.xlane.xlu1 %1286 }
 0x308   : > { %v1475_v59 = vmul.f32 %v3564_v39, %v1287_v56  ;;  %v1290_v26 = vpop.xlane.xlu2 %1289 }
 0x309   : > { %v1855_v61 = vperm.slane %v1474_v3, %v2957_v28  ;;  %v1476_v42 = vmul.f32 %v3564_v39, %v1290_v26 }
 0x30a   : > { %v1857_v62 = vperm.slane %v1475_v59, %v2960_v50 }
 0x30b   : > { %v1856_v63 = vsel %vm1647_vm4, %v1855_v61, %v1854_v36  ;;  %v1859_v2 = vperm.slane %v1476_v42, %v2966_v18 }
 0x30c   : > { %v1858_v33 = vsel %vm1651_vm5, %v1857_v62, %v1856_v63 }
 0x30d   : > { %v1860_v52 = vsel %vm1655_vm6, %v1859_v2, %v1858_v33 }
 0x30e   : > { %v1293_v6 = vpop.xlane.xlu0 %1292 }
 0x30f   : > { %v1477_v7 = vmul.f32 %v3564_v39, %v1293_v6  ;;  %v1296_v49 = vpop.xlane.xlu1 %1295 }
 0x310   : > { %v1478_v9 = vmul.f32 %v3564_v39, %v1296_v49  ;;  %v1299_v14 = vpop.xlane.xlu2 %1298 }
 0x311   : > { %v1861_v60 = vperm.slane %v1477_v7, %v2984_v10  ;;  %v1479_v5 = vmul.f32 %v3564_v39, %v1299_v14 }
 0x312   : > { %v1863_v23 = vperm.slane %v1478_v9, %v2987_v11 }
 0x313   : > { %v1862_v16 = vsel %vm1659_vm7, %v1861_v60, %v1860_v52  ;;  %v1865_v24 = vperm.slane %v1479_v5, %v2993_v25 }
 0x314   : > { %v1864_v1 = vsel %vm1663_vm8, %v1863_v23, %v1862_v16 }
 0x315   : > { %v1866_v35 = vsel %vm1667_vm9, %v1865_v24, %v1864_v1 }
 0x316   : > { %v1302_v30 = vpop.xlane.xlu0 %1301 }
 0x317   : > { %v1480_v32 = vmul.f32 %v3564_v39, %v1302_v30  ;;  %v1305_v37 = vpop.xlane.xlu1 %1304 }
 0x318   : > { %v1481_v38 = vmul.f32 %v3564_v39, %v1305_v37  ;;  %v1320_v22 = vpop.xlane.xlu2 %1319 }
 0x319   : > { %v1867_v40 = vperm.slane %v1480_v32, %v3011_v21  ;;  %v1486_v29 = vmul.f32 %v3601_v48, %v1320_v22 }
 0x31a   : > { %v1869_v41 = vperm.slane %v1481_v38, %v3014_v51 }
 0x31b   : > { %v1868_v46 = vsel %vm1671_vm10, %v1867_v40, %v1866_v35  ;;  %v1879_v56 = vperm.slane %v1486_v29, %v2920_v8 }
 0x31c   : > { %v1870_v47 = vsel %vm1675_vm11, %v1869_v41, %v1868_v46 }
 0x31e   : > { %v1323_v34 = vpop.xlane.xlu0 %1322 }
 0x31f   : > { %v1326_v44 = vpop.xlane.xlu1 %1325  ;;  %v1487_v15 = vmul.f32 %v3601_v48, %v1323_v34 }
 0x320   : > { %v1329_v54 = vpop.xlane.xlu2 %1328  ;;  %v1488_v36 = vmul.f32 %v3601_v48, %v1326_v44 }
 0x321   : > { %v1880_v3 = vperm.slane %v1487_v15, %v2928_v13  ;;  %v1489_v53 = vmul.f32 %v3601_v48, %v1329_v54 }
 0x322   : > { %v1882_v59 = vperm.slane %v1488_v36, %v2932_v0 }
 0x323   : > { %v1881_v61 = vsel %vm1635_vm1, %v1880_v3, %v1879_v56  ;;  %v1884_v62 = vperm.slane %v1489_v53, %v2938_v27  ;;  %vm3712_vm1 = vmmov %vm3711_vm0 }
 0x324   : > { %v1883_v33 = vsel %vm1639_vm2, %v1882_v59, %v1881_v61  ;;  %vm3713_vm2 = vmmov %vm3709_vm13 }
 0x325   : > { %v1885_v7 = vsel %vm1643_vm3, %v1884_v62, %v1883_v33  ;;  %vm1920_vm3 = vcmask 1046534  }
 0x326   : > { %v1332_v57 = vpop.xlane.xlu0 %1331 }
 0x327   : > { %v1335_v4 = vpop.xlane.xlu1 %1334  ;;  %v1490_v26 = vmul.f32 %v3601_v48, %v1332_v57 }
 0x328   : > { %v1338_v45 = vpop.xlane.xlu2 %1337  ;;  %v1491_v63 = vmul.f32 %v3601_v48, %v1335_v4 }
 0x329   : > { %v1886_v13 = vperm.slane %v1490_v26, %v2957_v28  ;;  %v1492_v6 = vmul.f32 %v3601_v48, %v1338_v45 }
 0x32a   : > { %v1888_v49 = vperm.slane %v1491_v63, %v2960_v50 }
 0x32b   : > { %v1887_v9 = vsel %vm1647_vm4, %v1886_v13, %v1885_v7  ;;  %v1890_v60 = vperm.slane %v1492_v6, %v2966_v18  ;;  %vm3714_vm4 = vmmov %vm3711_vm0 }
 0x32c   : > { %v1889_v23 = vsel %vm1651_vm5, %v1888_v49, %v1887_v9  ;;  %vm3715_vm5 = vmmov %vm3713_vm2 }
 0x32d   : > { %v1891_v18 = vsel %vm1655_vm6, %v1890_v60, %v1889_v23  ;;  %vm1922_vm6 = vcmask 1047559  }
 0x32e   : > { %v1341_v12 = vpop.xlane.xlu0 %1340 }
 0x32f   : > { %v1344_v55 = vpop.xlane.xlu1 %1343  ;;  %v1493_v27 = vmul.f32 %v3601_v48, %v1341_v12 }
 0x330   : > { %v1347_v19 = vpop.xlane.xlu2 %1346  ;;  %v1494_v28 = vmul.f32 %v3601_v48, %v1344_v55 }
 0x331   : > { %v1892_v16 = vperm.slane %v1493_v27, %v2984_v10  ;;  %v1495_v50 = vmul.f32 %v3601_v48, %v1347_v19 }
 0x332   : > { %v1894_v37 = vperm.slane %v1494_v28, %v2987_v11 }
 0x333   : > { %v1893_v22 = vsel %vm1659_vm7, %v1892_v16, %v1891_v18  ;;  %v1896_v41 = vperm.slane %v1495_v50, %v2993_v25 }
 0x334   : > { %v1895_v34 = vsel %vm1663_vm8, %v1894_v37, %v1893_v22 }
 0x335   : > { %v1897_v15 = vsel %vm1667_vm9, %v1896_v41, %v1895_v34 }
 0x336   : > { %v1350_v42 = vpop.xlane.xlu0 %1349 }
 0x337   : > { %v1308_v2 = vpop.xlane.xlu1 %1307  ;;  %v1496_v38 = vmul.f32 %v3601_v48, %v1350_v42 }
 0x338   : > { %v1482_v8 = vmul.f32 %v3564_v39, %v1308_v2  ;;  %v1353_v52 = vpop.xlane.xlu2 %1352 }
 0x339   : > { %v1497_v46 = vmul.f32 %v3601_v48, %v1353_v52  ;;  %v1898_v44 = vperm.slane %v1496_v38, %v3011_v21 }
 0x33a   : > { %v1871_v0 = vperm.slane %v1482_v8, %v3020_v58 }
 0x33b   : > { %v1900_v12 = vperm.slane %v1497_v46, %v3014_v51  ;;  %v1899_v29 = vsel %vm1671_vm10, %v1898_v44, %v1897_v15 }
 0x33c   : > { %v1872_v14 = vsel %vm3712_vm1, %v1871_v0, %v1870_v47 }
 0x33d   : > { %v1901_v3 = vsel %vm1675_vm11, %v1900_v12, %v1899_v29 }
 0x33e   : > { %v1311_v5 = vpop.xlane.xlu0 %1310 }
 0x33f   : > { %v1483_v24 = vmul.f32 %v3564_v39, %v1311_v5  ;;  %v1356_v1 = vpop.xlane.xlu1 %1355 }
 0x340   : > { %v1314_v35 = vpop.xlane.xlu2 %1313  ;;  %v1498_v11 = vmul.f32 %v3601_v48, %v1356_v1 }
 0x341   : > { %v1873_v30 = vperm.slane %v1483_v24, %v3038_v17  ;;  %v1484_v32 = vmul.f32 %v3564_v39, %v1314_v35 }
 0x342   : > { %v1902_v21 = vperm.slane %v1498_v11, %v3020_v58 }
 0x343   : > { %v1874_v10 = vsel %vm3713_vm2, %v1873_v30, %v1872_v14  ;;  %v1875_v40 = vperm.slane %v1484_v32, %v3041_v20 }
 0x344   : > { %v1903_v51 = vsel %vm3714_vm4, %v1902_v21, %v1901_v3 }
 0x345   : > { %v1876_v47 = vsel %vm1687_vm14, %v1875_v40, %v1874_v10 }
 0x346   : > { %v1359_v54 = vpop.xlane.xlu0 %1358 }
 0x347   : > { %v1499_v57 = vmul.f32 %v3601_v48, %v1359_v54  ;;  %v1317_v4 = vpop.xlane.xlu1 %1316 }
 0x348   : > { %v1485_v45 = vmul.f32 %v3564_v39, %v1317_v4  ;;  %v1362_v25 = vpop.xlane.xlu2 %1361 }
 0x349   : > { %v1500_v36 = vmul.f32 %v3601_v48, %v1362_v25  ;;  %v1904_v19 = vperm.slane %v1499_v57, %v3038_v17 }
 0x34a   : > { %v1877_v55 = vperm.slane %v1485_v45, %v3047_v31 }
 0x34b   : > { %v1906_v58 = vperm.slane %v1500_v36, %v3041_v20  ;;  %v1905_v59 = vsel %vm3715_vm5, %v1904_v19, %v1903_v51 }
 0x34c   : > { %v1878_v39 = vsel %vm1691_vm15, %v1877_v55, %v1876_v47 }
 0x34d   : > { %v1921_v56 = vsel %vm1920_vm3, %v1878_v39, %v3562_v43  ;;  %v1907_v26 = vsel %vm1687_vm14, %v1906_v58, %v1905_v59 }
 0x34e   : > { %v1365_v53 = vpop.xlane.xlu0 %1364 }
 0x34f   : > { %v1501_v17 = vmul.f32 %v3601_v48, %v1365_v53 }
 0x351   : > { %v1908_v43 = vperm.slane %v1501_v17, %v3047_v31 }
 0x353   : > { %v1909_v61 = vsel %vm1691_vm15, %v1908_v43, %v1907_v26 }
 0x354   : > { %v1923_v42 = vsel %vm1922_vm6, %v1909_v61, %v1921_v56 }
 0x355   : > { %1925 = vst [vmem:[%s193_s28] sm:$0xff] %v1923_v42 }
 0x356   : > { %2306 = shalt.err (!%p2303_p3)
}
 0x357   : > { %2014 = dma.vmem_to_hbm [thread:$0]  (%p2404_p5), %s1940_s29, 128, %s1942_s30, %s1927_s27  }
 0x358 PF: > { %p2020_p4 = scmp.ge.s32.totalorder %s2341_s18, 2  ;;  %s1953_s13 = sand.u32 1, %s2329_s15  }
 0x359   : > { %s1954_s14 = scalar_lea.sflag [#allocation3], %s1953_s13 }
 0x35a   : > { %p2017_p7 = pnand %p2020_p4, %p2408_p6 }
 0x35c   : > { %p2018_p8 = pneg %p2017_p7 }
 0x35e   : > { %2324 = dma.done.wait (%p2018_p8), %s1954_s14, 128  }
 0x35f   : > { %2326 = vsyncadd (%p2018_p8), %s1954_s14, 4294967168  ;;  %p14_p9 = scmp.ge.s32.totalorder %s2392_s21, 4   ;;  %s3716_s15 = smov %s2333_s16 }
 0x360   : > { %s3717_s16 = smov %s2337_s17  ;;  %s3718_s17 = smov %s2402_s24 }
 0x361   : > { %s3719_s18 = smov %s2392_s21  ;;  %16 = sbr.rel (!%p14_p9) target bundleno = 3 (0x3), region = 71 }
 0x366   :  { %1960 = vsyncpa [#allocation3], 1 }
 0x367   :  { %1962 = vsyncpa [#allocation3 + $0x1], 1 }

</bundles_post_ra>
